<compile_context>
chip_gen: v5e
topology: v5e:2x2
jax: 0.10.0
libtpu: 0.0.40
codegen_flags: <defaults>
</compile_context>

<pallas_src>
import jax
import jax.numpy as jnp
import numpy as np
from jax import lax
from jax.experimental import pallas as pl
from jax.experimental.pallas import tpu as pltpu

_GATE_ORDER = (0, 1, 3, 2)  # torch gate rows (i, f, g, o) -> kernel gate order (i, f, o, g)


def _round_up(x, m):
    return (x + m - 1) // m * m


def char_bilstm_kernel(x_ref, len_ref, wx_ref, b_ref, whh_ref, out_ref, gx_s):
    """Bidirectional LSTM over a (Tw, TN, 2E) tile; writes final states (TN, 2*Hp).

    x_ref feature dim is [x_fwd(t) | x_bwd(t)] where x_bwd was pre-gathered in
    per-word reversed order, so both directions advance with the same t and are
    masked by the same `lens > t` condition (pack_padded_sequence semantics).
    """
    T, TN, _ = x_ref.shape
    Hp2 = out_ref.shape[1]          # 2 * Hp  (multiple of 128)

    # ---- Hoisted input projection: ONE bf16 MXU matmul for both directions,
    # all T steps, bias folded in, written once into the merged scratch. ----
    x2d = x_ref[...].reshape(T * TN, x_ref.shape[2])
    gx_s[...] = (jnp.dot(x2d, wx_ref[...], preferred_element_type=jnp.float32)
                 + b_ref[...])

    lens = len_ref[...]                                   # (TN, 1) int32
    whh = whh_ref[...]                                    # (2Hp, 8Hp) bf16 block-diag

    def body(t, carry):
        h, c = carry                                      # (TN, 2Hp) f32 each
        # Single fused hidden projection for both directions (bf16 operands).
        zh = jnp.dot(h.astype(jnp.bfloat16), whh,
                     preferred_element_type=jnp.float32)  # (TN, 8Hp)
        r = pl.multiple_of(t * TN, TN)
        z = zh + gx_s[pl.ds(r, TN), :]

        # Gate layout: [i(2Hp) | f(2Hp) | o(2Hp) | g(2Hp)].
        # Logistic via one tanh EUP pass: sigmoid(x) = 0.5*tanh(0.5*x) + 0.5.
        zs = 0.5 * jnp.tanh(0.5 * z[:, :3 * Hp2]) + 0.5
        i_g = zs[:, 0 * Hp2:1 * Hp2]
        f_g = zs[:, 1 * Hp2:2 * Hp2]
        o_g = zs[:, 2 * Hp2:3 * Hp2]
        g_g = jnp.tanh(z[:, 3 * Hp2:])

        c_new = f_g * c + i_g * g_g
        h_new = o_g * jnp.tanh(c_new)

        # pack_padded_sequence semantics: update only inside each word's length
        # (same condition for both directions thanks to the pre-reversed x_bwd).
        m = lens > t                                       # (TN, 1) -> broadcast
        h = jnp.where(m, h_new, h)
        c = jnp.where(m, c_new, c)
        return h, c

    zeros = jnp.zeros((TN, Hp2), jnp.float32)
    h, _ = lax.fori_loop(0, T, body, (zeros, zeros),
                         unroll=(True if T <= 16 else 8))

    # Lane-dense full-width store (2Hp is a multiple of 128).
    out_ref[...] = h


class CharLSTMEncoderPallas:
    def __init__(self, char_embedding_dim, word_encoding_dim, num_vocab, key):
        assert word_encoding_dim % 2 == 0
        self.E = char_embedding_dim
        self.H = word_encoding_dim // 2            # per-direction hidden
        self.Hp = _round_up(self.H, 64)            # padded so 2*Hp is a lane multiple
        self.D_out = word_encoding_dim
        self.V = num_vocab

        H, Hp, E = self.H, self.Hp, self.E
        ks = jax.random.split(key, 9)
        bound = 1.0 / np.sqrt(H)
        u = lambda k, shape: jax.random.uniform(k, shape, jnp.float32, -bound, bound)

        # Embedding table (V, E): f32 master + bf16 copy for the kernel path.
        self.emb = jax.random.normal(ks[0], (self.V, E), jnp.float32) * 0.1
        self.emb_bf16 = self.emb.astype(jnp.bfloat16)

        # Raw PyTorch-layout LSTM weights (gate rows i, f, g, o).
        self.w_ih_f = u(ks[1], (4 * H, E))
        self.w_hh_f = u(ks[2], (4 * H, H))
        self.bias_f = (u(ks[3], (4 * H,)) + u(ks[4], (4 * H,)))   # b_ih + b_hh
        self.w_ih_b = u(ks[5], (4 * H, E))
        self.w_hh_b = u(ks[6], (4 * H, H))
        self.bias_b = (u(ks[7], (4 * H,)) + u(ks[8], (4 * H,)))

        # ---- Pack into fused / padded kernel layouts (host-side, init-time). ----
        # Gate columns (8*Hp): for gate gi in (i,f,o,g): [fwd Hp | bwd Hp].
        # wx rows (2*E): rows [0:E] contract with x_fwd, rows [E:2E] with x_bwd.
        # whh rows (2*Hp): rows [0:Hp] = fwd hidden, rows [Hp:2Hp] = bwd hidden.
        wx = np.zeros((2 * E, 8 * Hp), np.float32)
        wh = np.zeros((2 * Hp, 8 * Hp), np.float32)
        b = np.zeros((1, 8 * Hp), np.float32)
        dirs = [(self.w_ih_f, self.w_hh_f, self.bias_f),
                (self.w_ih_b, self.w_hh_b, self.bias_b)]
        for d, (w_ih, w_hh, bias) in enumerate(dirs):
            w_ih = np.asarray(w_ih); w_hh = np.asarray(w_hh); bias = np.asarray(bias)
            for gi, tg in enumerate(_GATE_ORDER):
                cols = slice(gi * 2 * Hp + d * Hp, gi * 2 * Hp + d * Hp + H)
                wx[d * E:(d + 1) * E, cols] = w_ih[tg * H:(tg + 1) * H, :].T
                wh[d * Hp:d * Hp + H, cols] = w_hh[tg * H:(tg + 1) * H, :].T
                b[0, cols] = bias[tg * H:(tg + 1) * H]

        self.wx_cat = jnp.asarray(wx, jnp.bfloat16)    # (2E, 8Hp) fused input proj
        self.whh_cat = jnp.asarray(wh, jnp.bfloat16)   # (2Hp, 8Hp) block-diag hidden proj
        self.b_cat = jnp.asarray(b, jnp.float32)       # (1, 8Hp) combined bias

    def _select_tile(self, N, Tw):
        Hp = self.Hp
        if N <= 8:
            return _round_up(max(N, 1), 8)
        TN = 256
        # Keep the merged scratch under ~12 MiB (fits v7x 64 MiB VMEM with headroom).
        while TN > 8 and Tw * TN * 8 * Hp * 4 > (12 << 20):
            TN //= 2
        # Prefer >= 2 grid steps (v7x megacore) and avoid padded-row waste.
        while TN > 8 and N < 2 * TN:
            TN //= 2
        if N < TN:
            TN = _round_up(N, 8)
        return TN

    def __call__(self, chars, char_seq_len):
        B, S, Tw = chars.shape
        H, Hp, E = self.H, self.Hp, self.E
        N = B * S

        TN = self._select_tile(N, Tw)
        Npad = _round_up(N, TN)

        chars_flat = chars.reshape(N, Tw)
        lens = char_seq_len.reshape(N).astype(jnp.int32)

        # Per-word reversed character order for the backward direction, gathered
        # in plain JAX.  x_bwd[t] = emb[chars[L-1-t]] (masked for t >= L).
        t_idx = jnp.arange(Tw, dtype=jnp.int32)
        bwd_idx = jnp.maximum(lens[:, None] - 1 - t_idx[None, :], 0)   # (N, Tw)
        chars_bwd = jnp.take_along_axis(chars_flat, bwd_idx, axis=1)

        # Time-major bf16 embedding gathers, concatenated along features so the
        # kernel does a single fused input-projection matmul.
        x_fwd = jnp.take(self.emb_bf16, chars_flat.T, axis=0)          # (Tw, N, E)
        x_bwd = jnp.take(self.emb_bf16, chars_bwd.T, axis=0)           # (Tw, N, E)
        x_cat = jnp.concatenate([x_fwd, x_bwd], axis=-1)               # (Tw, N, 2E)
        if Npad != N:
            x_cat = jnp.pad(x_cat, ((0, 0), (0, Npad - N), (0, 0)))
            lens = jnp.pad(lens, (0, Npad - N))    # len 0 => padded rows stay zero
        lens2d = lens.reshape(Npad, 1)

        # Explicit VMEM limit derived from the footprint (capped at v7x physical).
        scratch_bytes = Tw * TN * 8 * Hp * 4
        in_bytes = 2 * (Tw * TN * 2 * E * 2 + TN * 4)
        w_bytes = 2 * (2 * E * 8 * Hp * 2 + 8 * Hp * 4 + 2 * Hp * 8 * Hp * 2)
        out_bytes = 2 * TN * 2 * Hp * 4
        vmem_limit = int(min(64 << 20,
                             max(32 << 20,
                                 2 * scratch_bytes + in_bytes + w_bytes + out_bytes
                                 + (4 << 20))))

        full = lambda i: (0, 0)
        out_k = pl.pallas_call(
            char_bilstm_kernel,
            out_shape=jax.ShapeDtypeStruct((Npad, 2 * Hp), jnp.float32),
            grid_spec=pltpu.PrefetchScalarGridSpec(
                num_scalar_prefetch=0,
                grid=(Npad // TN,),
                in_specs=[
                    pl.BlockSpec((Tw, TN, 2 * E), lambda i: (0, i, 0)),   # x tile
                    pl.BlockSpec((TN, 1), lambda i: (i, 0)),              # lengths
                    pl.BlockSpec((2 * E, 8 * Hp), full),                  # fused W_ih
                    pl.BlockSpec((1, 8 * Hp), full),                      # combined bias
                    pl.BlockSpec((2 * Hp, 8 * Hp), full),                 # fused W_hh
                ],
                out_specs=pl.BlockSpec((TN, 2 * Hp), lambda i: (i, 0)),
                scratch_shapes=[
                    pltpu.VMEM((Tw * TN, 8 * Hp), jnp.float32),           # merged x-gates
                ],
            ),
            compiler_params=pltpu.CompilerParams(
                dimension_semantics=("parallel",),
                vmem_limit_bytes=vmem_limit,
            ),
        )(x_cat, lens2d, self.wx_cat, self.b_cat, self.whh_cat)

        # forward final state concat backward final state, unpadded.
        ret = jnp.concatenate([out_k[:N, :H], out_k[:N, Hp:Hp + H]], axis=1)
        return ret.reshape(B, S, self.D_out)

    # Pure-JAX f32 reference (PyTorch semantics) for verification.
    def reference(self, chars, char_seq_len):
        B, S, Tw = chars.shape
        N = B * S
        H = self.H
        x = self.emb[chars.reshape(N, Tw)]                 # (N, Tw, E) f32
        L = char_seq_len.reshape(N).astype(jnp.int32)

        def run_dir(w_ih, w_hh, b, reverse):
            wih_T = w_ih.T
            whh_T = w_hh.T

            def step(carry, t):
                h, c = carry
                idx = jnp.where(reverse, Tw - 1 - t, t)
                x_t = x[:, idx, :]
                z = x_t @ wih_T + h @ whh_T + b
                i = jax.nn.sigmoid(z[:, :H])
                f = jax.nn.sigmoid(z[:, H:2 * H])
                g = jnp.tanh(z[:, 2 * H:3 * H])
                o = jax.nn.sigmoid(z[:, 3 * H:])
                c_new = f * c + i * g
                h_new = o * jnp.tanh(c_new)
                mask = (L > idx)[:, None]
                h = jnp.where(mask, h_new, h)
                c = jnp.where(mask, c_new, c)
                return (h, c), None

            init = (jnp.zeros((N, H), jnp.float32), jnp.zeros((N, H), jnp.float32))
            (h, _), _ = lax.scan(step, init, jnp.arange(Tw))
            return h

        hf = run_dir(self.w_ih_f, self.w_hh_f, self.bias_f, False)
        hb = run_dir(self.w_ih_b, self.w_hh_b, self.bias_b, True)
        return jnp.concatenate([hf, hb], axis=1).reshape(B, S, self.D_out)


if __name__ == "__main__":
    key = jax.random.PRNGKey(0)
    k_param, k_chars, k_lens = jax.random.split(key, 3)

    # Small shapes consistent with the module's forward
    B, S, Tw = 2, 4, 8              # batch, max_sent_len, max_word_len
    E, D_out, V = 16, 32, 64        # char_embedding_dim, word_encoding_dim, num_vocab

    enc = CharLSTMEncoderPallas(E, D_out, V, k_param)

    chars = jax.random.randint(k_chars, (B, S, Tw), 0, V, dtype=jnp.int32)
    char_seq_len = jax.random.randint(k_lens, (B, S), 1, Tw + 1, dtype=jnp.int32)

    out = enc(chars, char_seq_len)
    out = jax.block_until_ready(out)

    ref = jax.block_until_ready(enc.reference(chars, char_seq_len))
    # bf16 MXU operands => relaxed tolerance vs the f32 reference.
    np.testing.assert_allclose(np.asarray(out), np.asarray(ref), rtol=2e-2, atol=2e-2)
    assert out.shape == (B, S, D_out)

    print("KERNEL_OK")
</pallas_src>

<mosaic_0001>
module attributes {stable_mosaic.version = 11 : i64} {
  func.func @char_bilstm_kernel(%arg0: i32, %arg1: memref<8x8x32xbf16, #tpu.memory_space<vmem>>, %arg2: memref<8x1xi32, #tpu.memory_space<vmem>>, %arg3: memref<32x512xbf16, #tpu.memory_space<vmem>>, %arg4: memref<1x512xf32, #tpu.memory_space<vmem>>, %arg5: memref<128x512xbf16, #tpu.memory_space<vmem>>, %arg6: memref<8x128xf32, #tpu.memory_space<vmem>>, %arg7: memref<64x512xf32, #tpu.memory_space<vmem>>) attributes {dimension_semantics = [#tpu.dimension_semantics<parallel>], iteration_bounds = array<i64: 1>, scalar_prefetch = 0 : i64, scratch_operands = 1 : i64, tpu.core_type = #tpu.core_type<tc>, window_params = [{transform_indices = @transform_0, window_bounds = array<i64: 8, 8, 32>}, {transform_indices = @transform_1, window_bounds = array<i64: 8, 1>}, {pipeline_mode = #tpu.pipeline_mode<synchronous>, transform_indices = @transform_2, window_bounds = array<i64: 32, 512>}, {pipeline_mode = #tpu.pipeline_mode<synchronous>, transform_indices = @transform_3, window_bounds = array<i64: 1, 512>}, {pipeline_mode = #tpu.pipeline_mode<synchronous>, transform_indices = @transform_4, window_bounds = array<i64: 128, 512>}, {transform_indices = @transform_5, window_bounds = array<i64: 8, 128>}]} {
    %c0 = arith.constant 0 : index
    %c0_0 = arith.constant 0 : index
    %c0_1 = arith.constant 0 : index
    %0 = vector.load %arg1[%c0, %c0_0, %c0_1] : memref<8x8x32xbf16, #tpu.memory_space<vmem>>, vector<8x8x32xbf16>
    %1 = vector.shape_cast %0 : vector<8x8x32xbf16> to vector<64x32xbf16>
    %c0_2 = arith.constant 0 : index
    %c0_3 = arith.constant 0 : index
    %2 = vector.load %arg3[%c0_2, %c0_3] : memref<32x512xbf16, #tpu.memory_space<vmem>>, vector<32x512xbf16>
    %cst = arith.constant dense<0.000000e+00> : vector<64x512xf32>
    %3 = tpu.matmul %1, %2, %cst {dimension_numbers = #tpu.dot_dimension_numbers<[1], [0], [0], [1], [0, 0, 1, 1], [], []>} : vector<64x32xbf16>, vector<32x512xbf16>, vector<64x512xf32> -> vector<64x512xf32>
    %c0_4 = arith.constant 0 : index
    %c0_5 = arith.constant 0 : index
    %4 = vector.load %arg4[%c0_4, %c0_5] : memref<1x512xf32, #tpu.memory_space<vmem>>, vector<1x512xf32>
    %5 = vector.broadcast %4 : vector<1x512xf32> to vector<64x512xf32>
    %6 = arith.addf %3, %5 : vector<64x512xf32>
    %c0_6 = arith.constant 0 : index
    %c0_7 = arith.constant 0 : index
    %7 = vector.load %arg7[%c0_6, %c0_7] : memref<64x512xf32, #tpu.memory_space<vmem>>, vector<64x512xf32>
    tpu.vector_store %arg7[%c0_6, %c0_7], %6 {strides = array<i32>} : memref<64x512xf32, #tpu.memory_space<vmem>>, vector<64x512xf32>,
    %c0_8 = arith.constant 0 : index
    %c0_9 = arith.constant 0 : index
    %8 = vector.load %arg2[%c0_8, %c0_9] : memref<8x1xi32, #tpu.memory_space<vmem>>, vector<8x1xi32>
    %c0_10 = arith.constant 0 : index
    %c0_11 = arith.constant 0 : index
    %9 = vector.load %arg5[%c0_10, %c0_11] : memref<128x512xbf16, #tpu.memory_space<vmem>>, vector<128x512xbf16>
    %cst_12 = arith.constant 0.000000e+00 : f32
    %10 = vector.broadcast %cst_12 : f32 to vector<8x128xf32>
    %c0_i32 = arith.constant 0 : i32
    %11 = arith.truncf %10 : vector<8x128xf32> to vector<8x128xbf16>
    %cst_13 = arith.constant dense<0.000000e+00> : vector<8x512xf32>
    %12 = tpu.matmul %11, %9, %cst_13 {dimension_numbers = #tpu.dot_dimension_numbers<[1], [0], [0], [1], [0, 0, 1, 1], [], []>} : vector<8x128xbf16>, vector<128x512xbf16>, vector<8x512xf32> -> vector<8x512xf32>
    %c8_i32 = arith.constant 8 : i32
    %13 = arith.muli %c0_i32, %c8_i32 : i32
    %14 = tpu.assume_multiple %13, 8 : i32
    %15 = arith.index_cast %14 : i32 to index
    %c0_14 = arith.constant 0 : index
    %16 = vector.load %arg7[%15, %c0_14] : memref<64x512xf32, #tpu.memory_space<vmem>>, vector<8x512xf32>
    %17 = arith.addf %12, %16 : vector<8x512xf32>
    %18 = vector.extract_strided_slice %17 {offsets = [0, 0], sizes = [8, 384], strides = [1, 1]} : vector<8x512xf32> to vector<8x384xf32>
    %cst_15 = arith.constant 5.000000e-01 : f32
    %19 = vector.broadcast %cst_15 : f32 to vector<8x384xf32>
    %20 = arith.mulf %19, %18 : vector<8x384xf32>
    %21 = math.tanh %20 : vector<8x384xf32>
    %cst_16 = arith.constant 5.000000e-01 : f32
    %22 = vector.broadcast %cst_16 : f32 to vector<8x384xf32>
    %23 = arith.mulf %22, %21 : vector<8x384xf32>
    %cst_17 = arith.constant 5.000000e-01 : f32
    %24 = vector.broadcast %cst_17 : f32 to vector<8x384xf32>
    %25 = arith.addf %23, %24 : vector<8x384xf32>
    %26 = vector.extract_strided_slice %25 {offsets = [0, 0], sizes = [8, 128], strides = [1, 1]} : vector<8x384xf32> to vector<8x128xf32>
    %27 = vector.extract_strided_slice %25 {offsets = [0, 128], sizes = [8, 128], strides = [1, 1]} : vector<8x384xf32> to vector<8x128xf32>
    %28 = vector.extract_strided_slice %25 {offsets = [0, 256], sizes = [8, 128], strides = [1, 1]} : vector<8x384xf32> to vector<8x128xf32>
    %29 = vector.extract_strided_slice %17 {offsets = [0, 384], sizes = [8, 128], strides = [1, 1]} : vector<8x512xf32> to vector<8x128xf32>
    %30 = math.tanh %29 : vector<8x128xf32>
    %31 = arith.mulf %27, %10 : vector<8x128xf32>
    %32 = arith.mulf %26, %30 : vector<8x128xf32>
    %33 = arith.addf %31, %32 : vector<8x128xf32>
    %34 = math.tanh %33 : vector<8x128xf32>
    %35 = arith.mulf %28, %34 : vector<8x128xf32>
    %36 = vector.broadcast %c0_i32 : i32 to vector<8x1xi32>
    %37 = arith.cmpi sgt, %8, %36 : vector<8x1xi32>
    %38 = vector.shape_cast %37 : vector<8x1xi1> to vector<8x1xi1>
    %39 = vector.broadcast %38 : vector<8x1xi1> to vector<8x128xi1>
    %40 = arith.select %39, %35, %10 : vector<8x128xi1>, vector<8x128xf32>
    %41 = vector.shape_cast %37 : vector<8x1xi1> to vector<8x1xi1>
    %42 = vector.broadcast %41 : vector<8x1xi1> to vector<8x128xi1>
    %43 = arith.select %42, %33, %10 : vector<8x128xi1>, vector<8x128xf32>
    %c1_i32 = arith.constant 1 : i32
    %44 = arith.truncf %40 : vector<8x128xf32> to vector<8x128xbf16>
    %cst_18 = arith.constant dense<0.000000e+00> : vector<8x512xf32>
    %45 = tpu.matmul %44, %9, %cst_18 {dimension_numbers = #tpu.dot_dimension_numbers<[1], [0], [0], [1], [0, 0, 1, 1], [], []>} : vector<8x128xbf16>, vector<128x512xbf16>, vector<8x512xf32> -> vector<8x512xf32>
    %c8_i32_19 = arith.constant 8 : i32
    %46 = arith.muli %c1_i32, %c8_i32_19 : i32
    %47 = tpu.assume_multiple %46, 8 : i32
    %48 = arith.index_cast %47 : i32 to index
    %c0_20 = arith.constant 0 : index
    %49 = vector.load %arg7[%48, %c0_20] : memref<64x512xf32, #tpu.memory_space<vmem>>, vector<8x512xf32>
    %50 = arith.addf %45, %49 : vector<8x512xf32>
    %51 = vector.extract_strided_slice %50 {offsets = [0, 0], sizes = [8, 384], strides = [1, 1]} : vector<8x512xf32> to vector<8x384xf32>
    %cst_21 = arith.constant 5.000000e-01 : f32
    %52 = vector.broadcast %cst_21 : f32 to vector<8x384xf32>
    %53 = arith.mulf %52, %51 : vector<8x384xf32>
    %54 = math.tanh %53 : vector<8x384xf32>
    %cst_22 = arith.constant 5.000000e-01 : f32
    %55 = vector.broadcast %cst_22 : f32 to vector<8x384xf32>
    %56 = arith.mulf %55, %54 : vector<8x384xf32>
    %cst_23 = arith.constant 5.000000e-01 : f32
    %57 = vector.broadcast %cst_23 : f32 to vector<8x384xf32>
    %58 = arith.addf %56, %57 : vector<8x384xf32>
    %59 = vector.extract_strided_slice %58 {offsets = [0, 0], sizes = [8, 128], strides = [1, 1]} : vector<8x384xf32> to vector<8x128xf32>
    %60 = vector.extract_strided_slice %58 {offsets = [0, 128], sizes = [8, 128], strides = [1, 1]} : vector<8x384xf32> to vector<8x128xf32>
    %61 = vector.extract_strided_slice %58 {offsets = [0, 256], sizes = [8, 128], strides = [1, 1]} : vector<8x384xf32> to vector<8x128xf32>
    %62 = vector.extract_strided_slice %50 {offsets = [0, 384], sizes = [8, 128], strides = [1, 1]} : vector<8x512xf32> to vector<8x128xf32>
    %63 = math.tanh %62 : vector<8x128xf32>
    %64 = arith.mulf %60, %43 : vector<8x128xf32>
    %65 = arith.mulf %59, %63 : vector<8x128xf32>
    %66 = arith.addf %64, %65 : vector<8x128xf32>
    %67 = math.tanh %66 : vector<8x128xf32>
    %68 = arith.mulf %61, %67 : vector<8x128xf32>
    %69 = vector.broadcast %c1_i32 : i32 to vector<8x1xi32>
    %70 = arith.cmpi sgt, %8, %69 : vector<8x1xi32>
    %71 = vector.shape_cast %70 : vector<8x1xi1> to vector<8x1xi1>
    %72 = vector.broadcast %71 : vector<8x1xi1> to vector<8x128xi1>
    %73 = arith.select %72, %68, %40 : vector<8x128xi1>, vector<8x128xf32>
    %74 = vector.shape_cast %70 : vector<8x1xi1> to vector<8x1xi1>
    %75 = vector.broadcast %74 : vector<8x1xi1> to vector<8x128xi1>
    %76 = arith.select %75, %66, %43 : vector<8x128xi1>, vector<8x128xf32>
    %c2_i32 = arith.constant 2 : i32
    %77 = arith.truncf %73 : vector<8x128xf32> to vector<8x128xbf16>
    %cst_24 = arith.constant dense<0.000000e+00> : vector<8x512xf32>
    %78 = tpu.matmul %77, %9, %cst_24 {dimension_numbers = #tpu.dot_dimension_numbers<[1], [0], [0], [1], [0, 0, 1, 1], [], []>} : vector<8x128xbf16>, vector<128x512xbf16>, vector<8x512xf32> -> vector<8x512xf32>
    %c8_i32_25 = arith.constant 8 : i32
    %79 = arith.muli %c2_i32, %c8_i32_25 : i32
    %80 = tpu.assume_multiple %79, 8 : i32
    %81 = arith.index_cast %80 : i32 to index
    %c0_26 = arith.constant 0 : index
    %82 = vector.load %arg7[%81, %c0_26] : memref<64x512xf32, #tpu.memory_space<vmem>>, vector<8x512xf32>
    %83 = arith.addf %78, %82 : vector<8x512xf32>
    %84 = vector.extract_strided_slice %83 {offsets = [0, 0], sizes = [8, 384], strides = [1, 1]} : vector<8x512xf32> to vector<8x384xf32>
    %cst_27 = arith.constant 5.000000e-01 : f32
    %85 = vector.broadcast %cst_27 : f32 to vector<8x384xf32>
    %86 = arith.mulf %85, %84 : vector<8x384xf32>
    %87 = math.tanh %86 : vector<8x384xf32>
    %cst_28 = arith.constant 5.000000e-01 : f32
    %88 = vector.broadcast %cst_28 : f32 to vector<8x384xf32>
    %89 = arith.mulf %88, %87 : vector<8x384xf32>
    %cst_29 = arith.constant 5.000000e-01 : f32
    %90 = vector.broadcast %cst_29 : f32 to vector<8x384xf32>
    %91 = arith.addf %89, %90 : vector<8x384xf32>
    %92 = vector.extract_strided_slice %91 {offsets = [0, 0], sizes = [8, 128], strides = [1, 1]} : vector<8x384xf32> to vector<8x128xf32>
    %93 = vector.extract_strided_slice %91 {offsets = [0, 128], sizes = [8, 128], strides = [1, 1]} : vector<8x384xf32> to vector<8x128xf32>
    %94 = vector.extract_strided_slice %91 {offsets = [0, 256], sizes = [8, 128], strides = [1, 1]} : vector<8x384xf32> to vector<8x128xf32>
    %95 = vector.extract_strided_slice %83 {offsets = [0, 384], sizes = [8, 128], strides = [1, 1]} : vector<8x512xf32> to vector<8x128xf32>
    %96 = math.tanh %95 : vector<8x128xf32>
    %97 = arith.mulf %93, %76 : vector<8x128xf32>
    %98 = arith.mulf %92, %96 : vector<8x128xf32>
    %99 = arith.addf %97, %98 : vector<8x128xf32>
    %100 = math.tanh %99 : vector<8x128xf32>
    %101 = arith.mulf %94, %100 : vector<8x128xf32>
    %102 = vector.broadcast %c2_i32 : i32 to vector<8x1xi32>
    %103 = arith.cmpi sgt, %8, %102 : vector<8x1xi32>
    %104 = vector.shape_cast %103 : vector<8x1xi1> to vector<8x1xi1>
    %105 = vector.broadcast %104 : vector<8x1xi1> to vector<8x128xi1>
    %106 = arith.select %105, %101, %73 : vector<8x128xi1>, vector<8x128xf32>
    %107 = vector.shape_cast %103 : vector<8x1xi1> to vector<8x1xi1>
    %108 = vector.broadcast %107 : vector<8x1xi1> to vector<8x128xi1>
    %109 = arith.select %108, %99, %76 : vector<8x128xi1>, vector<8x128xf32>
    %c3_i32 = arith.constant 3 : i32
    %110 = arith.truncf %106 : vector<8x128xf32> to vector<8x128xbf16>
    %cst_30 = arith.constant dense<0.000000e+00> : vector<8x512xf32>
    %111 = tpu.matmul %110, %9, %cst_30 {dimension_numbers = #tpu.dot_dimension_numbers<[1], [0], [0], [1], [0, 0, 1, 1], [], []>} : vector<8x128xbf16>, vector<128x512xbf16>, vector<8x512xf32> -> vector<8x512xf32>
    %c8_i32_31 = arith.constant 8 : i32
    %112 = arith.muli %c3_i32, %c8_i32_31 : i32
    %113 = tpu.assume_multiple %112, 8 : i32
    %114 = arith.index_cast %113 : i32 to index
    %c0_32 = arith.constant 0 : index
    %115 = vector.load %arg7[%114, %c0_32] : memref<64x512xf32, #tpu.memory_space<vmem>>, vector<8x512xf32>
    %116 = arith.addf %111, %115 : vector<8x512xf32>
    %117 = vector.extract_strided_slice %116 {offsets = [0, 0], sizes = [8, 384], strides = [1, 1]} : vector<8x512xf32> to vector<8x384xf32>
    %cst_33 = arith.constant 5.000000e-01 : f32
    %118 = vector.broadcast %cst_33 : f32 to vector<8x384xf32>
    %119 = arith.mulf %118, %117 : vector<8x384xf32>
    %120 = math.tanh %119 : vector<8x384xf32>
    %cst_34 = arith.constant 5.000000e-01 : f32
    %121 = vector.broadcast %cst_34 : f32 to vector<8x384xf32>
    %122 = arith.mulf %121, %120 : vector<8x384xf32>
    %cst_35 = arith.constant 5.000000e-01 : f32
    %123 = vector.broadcast %cst_35 : f32 to vector<8x384xf32>
    %124 = arith.addf %122, %123 : vector<8x384xf32>
    %125 = vector.extract_strided_slice %124 {offsets = [0, 0], sizes = [8, 128], strides = [1, 1]} : vector<8x384xf32> to vector<8x128xf32>
    %126 = vector.extract_strided_slice %124 {offsets = [0, 128], sizes = [8, 128], strides = [1, 1]} : vector<8x384xf32> to vector<8x128xf32>
    %127 = vector.extract_strided_slice %124 {offsets = [0, 256], sizes = [8, 128], strides = [1, 1]} : vector<8x384xf32> to vector<8x128xf32>
    %128 = vector.extract_strided_slice %116 {offsets = [0, 384], sizes = [8, 128], strides = [1, 1]} : vector<8x512xf32> to vector<8x128xf32>
    %129 = math.tanh %128 : vector<8x128xf32>
    %130 = arith.mulf %126, %109 : vector<8x128xf32>
    %131 = arith.mulf %125, %129 : vector<8x128xf32>
    %132 = arith.addf %130, %131 : vector<8x128xf32>
    %133 = math.tanh %132 : vector<8x128xf32>
    %134 = arith.mulf %127, %133 : vector<8x128xf32>
    %135 = vector.broadcast %c3_i32 : i32 to vector<8x1xi32>
    %136 = arith.cmpi sgt, %8, %135 : vector<8x1xi32>
    %137 = vector.shape_cast %136 : vector<8x1xi1> to vector<8x1xi1>
    %138 = vector.broadcast %137 : vector<8x1xi1> to vector<8x128xi1>
    %139 = arith.select %138, %134, %106 : vector<8x128xi1>, vector<8x128xf32>
    %140 = vector.shape_cast %136 : vector<8x1xi1> to vector<8x1xi1>
    %141 = vector.broadcast %140 : vector<8x1xi1> to vector<8x128xi1>
    %142 = arith.select %141, %132, %109 : vector<8x128xi1>, vector<8x128xf32>
    %c4_i32 = arith.constant 4 : i32
    %143 = arith.truncf %139 : vector<8x128xf32> to vector<8x128xbf16>
    %cst_36 = arith.constant dense<0.000000e+00> : vector<8x512xf32>
    %144 = tpu.matmul %143, %9, %cst_36 {dimension_numbers = #tpu.dot_dimension_numbers<[1], [0], [0], [1], [0, 0, 1, 1], [], []>} : vector<8x128xbf16>, vector<128x512xbf16>, vector<8x512xf32> -> vector<8x512xf32>
    %c8_i32_37 = arith.constant 8 : i32
    %145 = arith.muli %c4_i32, %c8_i32_37 : i32
    %146 = tpu.assume_multiple %145, 8 : i32
    %147 = arith.index_cast %146 : i32 to index
    %c0_38 = arith.constant 0 : index
    %148 = vector.load %arg7[%147, %c0_38] : memref<64x512xf32, #tpu.memory_space<vmem>>, vector<8x512xf32>
    %149 = arith.addf %144, %148 : vector<8x512xf32>
    %150 = vector.extract_strided_slice %149 {offsets = [0, 0], sizes = [8, 384], strides = [1, 1]} : vector<8x512xf32> to vector<8x384xf32>
    %cst_39 = arith.constant 5.000000e-01 : f32
    %151 = vector.broadcast %cst_39 : f32 to vector<8x384xf32>
    %152 = arith.mulf %151, %150 : vector<8x384xf32>
    %153 = math.tanh %152 : vector<8x384xf32>
    %cst_40 = arith.constant 5.000000e-01 : f32
    %154 = vector.broadcast %cst_40 : f32 to vector<8x384xf32>
    %155 = arith.mulf %154, %153 : vector<8x384xf32>
    %cst_41 = arith.constant 5.000000e-01 : f32
    %156 = vector.broadcast %cst_41 : f32 to vector<8x384xf32>
    %157 = arith.addf %155, %156 : vector<8x384xf32>
    %158 = vector.extract_strided_slice %157 {offsets = [0, 0], sizes = [8, 128], strides = [1, 1]} : vector<8x384xf32> to vector<8x128xf32>
    %159 = vector.extract_strided_slice %157 {offsets = [0, 128], sizes = [8, 128], strides = [1, 1]} : vector<8x384xf32> to vector<8x128xf32>
    %160 = vector.extract_strided_slice %157 {offsets = [0, 256], sizes = [8, 128], strides = [1, 1]} : vector<8x384xf32> to vector<8x128xf32>
    %161 = vector.extract_strided_slice %149 {offsets = [0, 384], sizes = [8, 128], strides = [1, 1]} : vector<8x512xf32> to vector<8x128xf32>
    %162 = math.tanh %161 : vector<8x128xf32>
    %163 = arith.mulf %159, %142 : vector<8x128xf32>
    %164 = arith.mulf %158, %162 : vector<8x128xf32>
    %165 = arith.addf %163, %164 : vector<8x128xf32>
    %166 = math.tanh %165 : vector<8x128xf32>
    %167 = arith.mulf %160, %166 : vector<8x128xf32>
    %168 = vector.broadcast %c4_i32 : i32 to vector<8x1xi32>
    %169 = arith.cmpi sgt, %8, %168 : vector<8x1xi32>
    %170 = vector.shape_cast %169 : vector<8x1xi1> to vector<8x1xi1>
    %171 = vector.broadcast %170 : vector<8x1xi1> to vector<8x128xi1>
    %172 = arith.select %171, %167, %139 : vector<8x128xi1>, vector<8x128xf32>
    %173 = vector.shape_cast %169 : vector<8x1xi1> to vector<8x1xi1>
    %174 = vector.broadcast %173 : vector<8x1xi1> to vector<8x128xi1>
    %175 = arith.select %174, %165, %142 : vector<8x128xi1>, vector<8x128xf32>
    %c5_i32 = arith.constant 5 : i32
    %176 = arith.truncf %172 : vector<8x128xf32> to vector<8x128xbf16>
    %cst_42 = arith.constant dense<0.000000e+00> : vector<8x512xf32>
    %177 = tpu.matmul %176, %9, %cst_42 {dimension_numbers = #tpu.dot_dimension_numbers<[1], [0], [0], [1], [0, 0, 1, 1], [], []>} : vector<8x128xbf16>, vector<128x512xbf16>, vector<8x512xf32> -> vector<8x512xf32>
    %c8_i32_43 = arith.constant 8 : i32
    %178 = arith.muli %c5_i32, %c8_i32_43 : i32
    %179 = tpu.assume_multiple %178, 8 : i32
    %180 = arith.index_cast %179 : i32 to index
    %c0_44 = arith.constant 0 : index
    %181 = vector.load %arg7[%180, %c0_44] : memref<64x512xf32, #tpu.memory_space<vmem>>, vector<8x512xf32>
    %182 = arith.addf %177, %181 : vector<8x512xf32>
    %183 = vector.extract_strided_slice %182 {offsets = [0, 0], sizes = [8, 384], strides = [1, 1]} : vector<8x512xf32> to vector<8x384xf32>
    %cst_45 = arith.constant 5.000000e-01 : f32
    %184 = vector.broadcast %cst_45 : f32 to vector<8x384xf32>
    %185 = arith.mulf %184, %183 : vector<8x384xf32>
    %186 = math.tanh %185 : vector<8x384xf32>
    %cst_46 = arith.constant 5.000000e-01 : f32
    %187 = vector.broadcast %cst_46 : f32 to vector<8x384xf32>
    %188 = arith.mulf %187, %186 : vector<8x384xf32>
    %cst_47 = arith.constant 5.000000e-01 : f32
    %189 = vector.broadcast %cst_47 : f32 to vector<8x384xf32>
    %190 = arith.addf %188, %189 : vector<8x384xf32>
    %191 = vector.extract_strided_slice %190 {offsets = [0, 0], sizes = [8, 128], strides = [1, 1]} : vector<8x384xf32> to vector<8x128xf32>
    %192 = vector.extract_strided_slice %190 {offsets = [0, 128], sizes = [8, 128], strides = [1, 1]} : vector<8x384xf32> to vector<8x128xf32>
    %193 = vector.extract_strided_slice %190 {offsets = [0, 256], sizes = [8, 128], strides = [1, 1]} : vector<8x384xf32> to vector<8x128xf32>
    %194 = vector.extract_strided_slice %182 {offsets = [0, 384], sizes = [8, 128], strides = [1, 1]} : vector<8x512xf32> to vector<8x128xf32>
    %195 = math.tanh %194 : vector<8x128xf32>
    %196 = arith.mulf %192, %175 : vector<8x128xf32>
    %197 = arith.mulf %191, %195 : vector<8x128xf32>
    %198 = arith.addf %196, %197 : vector<8x128xf32>
    %199 = math.tanh %198 : vector<8x128xf32>
    %200 = arith.mulf %193, %199 : vector<8x128xf32>
    %201 = vector.broadcast %c5_i32 : i32 to vector<8x1xi32>
    %202 = arith.cmpi sgt, %8, %201 : vector<8x1xi32>
    %203 = vector.shape_cast %202 : vector<8x1xi1> to vector<8x1xi1>
    %204 = vector.broadcast %203 : vector<8x1xi1> to vector<8x128xi1>
    %205 = arith.select %204, %200, %172 : vector<8x128xi1>, vector<8x128xf32>
    %206 = vector.shape_cast %202 : vector<8x1xi1> to vector<8x1xi1>
    %207 = vector.broadcast %206 : vector<8x1xi1> to vector<8x128xi1>
    %208 = arith.select %207, %198, %175 : vector<8x128xi1>, vector<8x128xf32>
    %c6_i32 = arith.constant 6 : i32
    %209 = arith.truncf %205 : vector<8x128xf32> to vector<8x128xbf16>
    %cst_48 = arith.constant dense<0.000000e+00> : vector<8x512xf32>
    %210 = tpu.matmul %209, %9, %cst_48 {dimension_numbers = #tpu.dot_dimension_numbers<[1], [0], [0], [1], [0, 0, 1, 1], [], []>} : vector<8x128xbf16>, vector<128x512xbf16>, vector<8x512xf32> -> vector<8x512xf32>
    %c8_i32_49 = arith.constant 8 : i32
    %211 = arith.muli %c6_i32, %c8_i32_49 : i32
    %212 = tpu.assume_multiple %211, 8 : i32
    %213 = arith.index_cast %212 : i32 to index
    %c0_50 = arith.constant 0 : index
    %214 = vector.load %arg7[%213, %c0_50] : memref<64x512xf32, #tpu.memory_space<vmem>>, vector<8x512xf32>
    %215 = arith.addf %210, %214 : vector<8x512xf32>
    %216 = vector.extract_strided_slice %215 {offsets = [0, 0], sizes = [8, 384], strides = [1, 1]} : vector<8x512xf32> to vector<8x384xf32>
    %cst_51 = arith.constant 5.000000e-01 : f32
    %217 = vector.broadcast %cst_51 : f32 to vector<8x384xf32>
    %218 = arith.mulf %217, %216 : vector<8x384xf32>
    %219 = math.tanh %218 : vector<8x384xf32>
    %cst_52 = arith.constant 5.000000e-01 : f32
    %220 = vector.broadcast %cst_52 : f32 to vector<8x384xf32>
    %221 = arith.mulf %220, %219 : vector<8x384xf32>
    %cst_53 = arith.constant 5.000000e-01 : f32
    %222 = vector.broadcast %cst_53 : f32 to vector<8x384xf32>
    %223 = arith.addf %221, %222 : vector<8x384xf32>
    %224 = vector.extract_strided_slice %223 {offsets = [0, 0], sizes = [8, 128], strides = [1, 1]} : vector<8x384xf32> to vector<8x128xf32>
    %225 = vector.extract_strided_slice %223 {offsets = [0, 128], sizes = [8, 128], strides = [1, 1]} : vector<8x384xf32> to vector<8x128xf32>
    %226 = vector.extract_strided_slice %223 {offsets = [0, 256], sizes = [8, 128], strides = [1, 1]} : vector<8x384xf32> to vector<8x128xf32>
    %227 = vector.extract_strided_slice %215 {offsets = [0, 384], sizes = [8, 128], strides = [1, 1]} : vector<8x512xf32> to vector<8x128xf32>
    %228 = math.tanh %227 : vector<8x128xf32>
    %229 = arith.mulf %225, %208 : vector<8x128xf32>
    %230 = arith.mulf %224, %228 : vector<8x128xf32>
    %231 = arith.addf %229, %230 : vector<8x128xf32>
    %232 = math.tanh %231 : vector<8x128xf32>
    %233 = arith.mulf %226, %232 : vector<8x128xf32>
    %234 = vector.broadcast %c6_i32 : i32 to vector<8x1xi32>
    %235 = arith.cmpi sgt, %8, %234 : vector<8x1xi32>
    %236 = vector.shape_cast %235 : vector<8x1xi1> to vector<8x1xi1>
    %237 = vector.broadcast %236 : vector<8x1xi1> to vector<8x128xi1>
    %238 = arith.select %237, %233, %205 : vector<8x128xi1>, vector<8x128xf32>
    %239 = vector.shape_cast %235 : vector<8x1xi1> to vector<8x1xi1>
    %240 = vector.broadcast %239 : vector<8x1xi1> to vector<8x128xi1>
    %241 = arith.select %240, %231, %208 : vector<8x128xi1>, vector<8x128xf32>
    %c7_i32 = arith.constant 7 : i32
    %242 = arith.truncf %238 : vector<8x128xf32> to vector<8x128xbf16>
    %cst_54 = arith.constant dense<0.000000e+00> : vector<8x512xf32>
    %243 = tpu.matmul %242, %9, %cst_54 {dimension_numbers = #tpu.dot_dimension_numbers<[1], [0], [0], [1], [0, 0, 1, 1], [], []>} : vector<8x128xbf16>, vector<128x512xbf16>, vector<8x512xf32> -> vector<8x512xf32>
    %c8_i32_55 = arith.constant 8 : i32
    %244 = arith.muli %c7_i32, %c8_i32_55 : i32
    %245 = tpu.assume_multiple %244, 8 : i32
    %246 = arith.index_cast %245 : i32 to index
    %c0_56 = arith.constant 0 : index
    %247 = vector.load %arg7[%246, %c0_56] : memref<64x512xf32, #tpu.memory_space<vmem>>, vector<8x512xf32>
    %248 = arith.addf %243, %247 : vector<8x512xf32>
    %249 = vector.extract_strided_slice %248 {offsets = [0, 0], sizes = [8, 384], strides = [1, 1]} : vector<8x512xf32> to vector<8x384xf32>
    %cst_57 = arith.constant 5.000000e-01 : f32
    %250 = vector.broadcast %cst_57 : f32 to vector<8x384xf32>
    %251 = arith.mulf %250, %249 : vector<8x384xf32>
    %252 = math.tanh %251 : vector<8x384xf32>
    %cst_58 = arith.constant 5.000000e-01 : f32
    %253 = vector.broadcast %cst_58 : f32 to vector<8x384xf32>
    %254 = arith.mulf %253, %252 : vector<8x384xf32>
    %cst_59 = arith.constant 5.000000e-01 : f32
    %255 = vector.broadcast %cst_59 : f32 to vector<8x384xf32>
    %256 = arith.addf %254, %255 : vector<8x384xf32>
    %257 = vector.extract_strided_slice %256 {offsets = [0, 0], sizes = [8, 128], strides = [1, 1]} : vector<8x384xf32> to vector<8x128xf32>
    %258 = vector.extract_strided_slice %256 {offsets = [0, 128], sizes = [8, 128], strides = [1, 1]} : vector<8x384xf32> to vector<8x128xf32>
    %259 = vector.extract_strided_slice %256 {offsets = [0, 256], sizes = [8, 128], strides = [1, 1]} : vector<8x384xf32> to vector<8x128xf32>
    %260 = vector.extract_strided_slice %248 {offsets = [0, 384], sizes = [8, 128], strides = [1, 1]} : vector<8x512xf32> to vector<8x128xf32>
    %261 = math.tanh %260 : vector<8x128xf32>
    %262 = arith.mulf %258, %241 : vector<8x128xf32>
    %263 = arith.mulf %257, %261 : vector<8x128xf32>
    %264 = arith.addf %262, %263 : vector<8x128xf32>
    %265 = math.tanh %264 : vector<8x128xf32>
    %266 = arith.mulf %259, %265 : vector<8x128xf32>
    %267 = vector.broadcast %c7_i32 : i32 to vector<8x1xi32>
    %268 = arith.cmpi sgt, %8, %267 : vector<8x1xi32>
    %269 = vector.shape_cast %268 : vector<8x1xi1> to vector<8x1xi1>
    %270 = vector.broadcast %269 : vector<8x1xi1> to vector<8x128xi1>
    %271 = arith.select %270, %266, %238 : vector<8x128xi1>, vector<8x128xf32>
    %272 = vector.shape_cast %268 : vector<8x1xi1> to vector<8x1xi1>
    %273 = vector.broadcast %272 : vector<8x1xi1> to vector<8x128xi1>
    %274 = arith.select %273, %264, %241 : vector<8x128xi1>, vector<8x128xf32>
    %c8_i32_60 = arith.constant 8 : i32
    %c0_61 = arith.constant 0 : index
    %c0_62 = arith.constant 0 : index
    %275 = vector.load %arg6[%c0_61, %c0_62] : memref<8x128xf32, #tpu.memory_space<vmem>>, vector<8x128xf32>
    tpu.vector_store %arg6[%c0_61, %c0_62], %271 {strides = array<i32>} : memref<8x128xf32, #tpu.memory_space<vmem>>, vector<8x128xf32>,
    return
  }
  func.func @transform_0(%arg0: i32) -> (i32, i32, i32) {
    %c0_i32 = arith.constant 0 : i32
    %c0_i32_0 = arith.constant 0 : i32
    %c0_i32_1 = arith.constant 0 : i32
    return %c0_i32, %arg0, %c0_i32_0 : i32, i32, i32
  }
  func.func @transform_1(%arg0: i32) -> (i32, i32) {
    %c0_i32 = arith.constant 0 : i32
    %c0_i32_0 = arith.constant 0 : i32
    return %arg0, %c0_i32 : i32, i32
  }
  func.func @transform_2(%arg0: i32) -> (i32, i32) {
    %c0_i32 = arith.constant 0 : i32
    %c0_i32_0 = arith.constant 0 : i32
    %c0_i32_1 = arith.constant 0 : i32
    return %c0_i32, %c0_i32_0 : i32, i32
  }
  func.func @transform_3(%arg0: i32) -> (i32, i32) {
    %c0_i32 = arith.constant 0 : i32
    %c0_i32_0 = arith.constant 0 : i32
    %c0_i32_1 = arith.constant 0 : i32
    return %c0_i32, %c0_i32_0 : i32, i32
  }
  func.func @transform_4(%arg0: i32) -> (i32, i32) {
    %c0_i32 = arith.constant 0 : i32
    %c0_i32_0 = arith.constant 0 : i32
    %c0_i32_1 = arith.constant 0 : i32
    return %c0_i32, %c0_i32_0 : i32, i32
  }
  func.func @transform_5(%arg0: i32) -> (i32, i32) {
    %c0_i32 = arith.constant 0 : i32
    %c0_i32_0 = arith.constant 0 : i32
    return %arg0, %c0_i32 : i32, i32
  }
}

</mosaic_0001>

<bundles_post_ra>
// kernel: tpu_custom_call.1
= control target key start
LH: loop header
LB: loop body
LE: loop exit
PB: predicated region body
PF: predicated region fallthrough
CT: control target
= control target key end

     0   :  { %10 = vsyncpa [#allocation4], 0  ;;  %s2234_s0 = inlined_call_operand.hbm [shape: bf16[8,8,32], index: 0, kind: input, shape index: {}]   ;;  %s2235_s1 = inlined_call_operand.vmem [shape: s32[8,1], index: 1, kind: input, shape index: {}]   ;;  %s2236_s2 = inlined_call_operand.hbm [shape: bf16[32,512], index: 2, kind: input, shape index: {}]   ;;  %s2237_s3 = inlined_call_operand.vmem [shape: f32[1,512], index: 3, kind: input, shape index: {}]   ;;  %s2238_s4 = inlined_call_operand.hbm [shape: bf16[128,512], index: 4, kind: input, shape index: {}]   ;;  %s2239_s5 = inlined_call_operand.hbm [shape: f32[8,128], index: 5, kind: output, shape index: {}]  }
   0x1   :  { %11 = vsyncpa [#allocation7], 0  ;;  %s32_s20 = sshll.u32 %s2236_s2, 4  ;;  %s33_s20 = int_to_ptr.hbm [resolvable:$true] %s32_s20 }
   0x2   :  { %12 = vsyncpa [#allocation5], 0  ;;  %s1663_s21 = smov [#allocation6]   ;;  %s17_s25 = sshll.u32 %s2234_s0, 4  ;;  %s18_s25 = int_to_ptr.hbm [resolvable:$true] %s17_s25 }
   0x3   :  { %s34_s22 = sshll.u32 %s1663_s21, 4  ;;  %s1664_s26 = smov 256   ;;  %s35_s22 = int_to_ptr.vmem [resolvable:$true] %s34_s22 }
   0x4   :  { %s1665_s27 = smov 16   ;;  %s1666_s28 = smov [#allocation3]  }
   0x5   :  { %40 = dma.hbm_to_vmem [thread:$0]  %s33_s20, 1024, %s35_s22, [#allocation7], %s1664_s26, %s1664_s26, %s1665_s27  }
   0x6   :  { %s19_s29 = sshll.u32 %s1666_s28, 4  ;;  %s1667_s30 = smov 64   ;;  %s20_s29 = int_to_ptr.vmem [resolvable:$true] %s19_s29 }
   0x7   :  { %s1668_s6 = smov 4   ;;  %s47_s8 = sshll.u32 %s2238_s4, 4  ;;  %s48_s8 = int_to_ptr.hbm [resolvable:$true] %s47_s8 }
   0x8   :  { %25 = dma.hbm_to_vmem [thread:$0]  %s18_s25, 512, %s20_s29, [#allocation4], %s1667_s30, %s1667_s30, %s1668_s6  }
   0x9   :  { %s1669_s9 = smov [#allocation8]  }
   0xa   :  { %s49_s10 = sshll.u32 %s1669_s9, 4  ;;  %s50_s10 = int_to_ptr.vmem [resolvable:$true] %s49_s10 }
   0xb   :  { %55 = dma.hbm_to_vmem [thread:$0]  %s48_s8, 4096, %s50_s10, [#allocation7], %s1664_s26, %s1664_s26, %s1665_s27  }
   0xc   :  { %1657 = dma.done.wait [#allocation4], 512  }
   0xd   :  { %1658 = vsyncadd [#allocation4], 4294966784 }
   0xe   :  { %1659 = dma.done.wait [#allocation7], 5120  }
   0xf   :  { %1660 = vsyncadd [#allocation7], 4294962176  ;;  %v1255_v0 = vld [vmem:[#allocation6 + $0x20] sm:$0xf]  ;;  %v1435_v1 = vld [vmem:[#allocation6 + $0x2c] sm:$0xf0] }
  0x10   :  { %v1433_v2 = vld [vmem:[#allocation6 + $0x24] sm:$0xf]  ;;  %v1256_v3 = vor.u32 %v1435_v1, %v1255_v0  ;;  %v1257_v4 = vld [vmem:[#allocation6 + $0x30] sm:$0xf0]  ;;  %v1263_v5 = vld [vmem:[#allocation6 + $0x28] sm:$0xf] }
  0x11   :  { %v1436_v6 = vld [vmem:[#allocation6 + $0x34] sm:$0xf0]  ;;  %v1260_v7 = vor.u32 %v1433_v2, %v1257_v4  ;;  %v1434_v9 = vld [vmem:[#allocation6 + $0x2c] sm:$0xf]  ;;  %v1265_v10 = vld [vmem:[#allocation6 + $0x38] sm:$0xf0] }
  0x12   :  { %v1264_v8 = vor.u32 %v1436_v6, %v1263_v5  ;;  %v1239_v11 = vld [vmem:[#allocation6] sm:$0xf]  ;;  %174 = vmatpush.bf16.msra.mxu0 %v1256_v3  ;;  %v1268_v12 = vor.u32 %v1434_v9, %v1265_v10  ;;  %v1431_v13 = vld [vmem:[#allocation6 + $0xc] sm:$0xf0]  ;;  %v1429_v14 = vld [vmem:[#allocation6 + $0x4] sm:$0xf] }
  0x13   :  { %v1241_v15 = vld [vmem:[#allocation6 + $0x10] sm:$0xf0]  ;;  %203 = vmatpush.bf16.msra.mxu1 %v1260_v7  ;;  %v1240_v16 = vor.u32 %v1431_v13, %v1239_v11  ;;  %v1247_v18 = vld [vmem:[#allocation6 + $0x8] sm:$0xf]  ;;  %v1432_v19 = vld [vmem:[#allocation6 + $0x14] sm:$0xf0] }
  0x14   :  { %232 = vmatpush.bf16.msra.mxu2 %v1264_v8  ;;  %v1244_v17 = vor.u32 %v1429_v14, %v1241_v15  ;;  %v1430_v20 = vld [vmem:[#allocation6 + $0xc] sm:$0xf]  ;;  %261 = vmatpush.bf16.msra.mxu3 %v1268_v12  ;;  %v1248_v21 = vor.u32 %v1432_v19, %v1247_v18  ;;  %v1249_v22 = vld [vmem:[#allocation6 + $0x18] sm:$0xf0]  ;;  %v1425_v23 = vld [vmem:[#allocation3] sm:$0xff]  ;;  %vm155_vm0 = vcmask 261120  }
  0x15   :  { %v1399_v24 = vld [vmem:[#allocation8 + $0xe0] sm:$0xf]  ;;  %v1252_v25 = vor.u32 %v1430_v20, %v1249_v22  ;;  %v1467_v26 = vld [vmem:[#allocation8 + $0xec] sm:$0xf0]  ;;  %v1465_v27 = vld [vmem:[#allocation8 + $0xe4] sm:$0xf] }
  0x16   :  { %v1401_v28 = vld [vmem:[#allocation8 + $0xf0] sm:$0xf0]  ;;  %175 = vmatpush.bf16.msra.mxu0 %v1240_v16  ;;  %v1711_v29 = vor.u32 %v1467_v26, %v1399_v24  ;;  %v1466_v31 = vld [vmem:[#allocation8 + $0xec] sm:$0xf]  ;;  %v1409_v32 = vld [vmem:[#allocation8 + $0xf8] sm:$0xf0] }
  0x17   :  { %v1713_v30 = vor.u32 %v1465_v27, %v1401_v28  ;;  %v1407_v33 = vld [vmem:[#allocation8 + $0xe8] sm:$0xf]  ;;  %204 = vmatpush.bf16.msra.mxu1 %v1244_v17  ;;  %v1468_v34 = vld [vmem:[#allocation8 + $0xf4] sm:$0xf0]  ;;  %v1383_v35 = vld [vmem:[#allocation8 + $0xc0] sm:$0xf]  ;;  %v1716_v37 = vor.u32 %v1466_v31, %v1409_v32 }
  0x18   :  { %233 = vmatpush.bf16.msra.mxu2 %v1248_v21  ;;  %v1463_v36 = vld [vmem:[#allocation8 + $0xcc] sm:$0xf0]  ;;  %262 = vmatpush.bf16.msra.mxu3 %v1252_v25  ;;  %v1718_v38 = vor.u32 %v1468_v34, %v1407_v33  ;;  %v1461_v40 = vld [vmem:[#allocation8 + $0xc4] sm:$0xf]  ;;  %v1385_v41 = vld [vmem:[#allocation8 + $0xd0] sm:$0xf0] }
  0x19   :  { %v1720_v39 = vor.u32 %v1463_v36, %v1383_v35  ;;  %v1462_v42 = vld [vmem:[#allocation8 + $0xcc] sm:$0xf]  ;;  %1269 = vmatmul.msk.bf16.vlgmr.msra.gmra.mxu0 %vm155_vm0, %v1425_v23  ;;  %v1724_v43 = vor.u32 %v1461_v40, %v1385_v41  ;;  %v1393_v44 = vld [vmem:[#allocation8 + $0xd8] sm:$0xf0]  ;;  %v1391_v45 = vld [vmem:[#allocation8 + $0xc8] sm:$0xf] }
  0x1a   :  { %516 = vmatpush.bf16.msrb.mxu0 %v1711_v29  ;;  %v1464_v46 = vld [vmem:[#allocation8 + $0xd4] sm:$0xf0]  ;;  %1273 = vmatmul.msk.bf16.vlgmr.msra.gmra.mxu1 %vm155_vm0, %v1425_v23  ;;  %v1367_v47 = vld [vmem:[#allocation8 + $0xa0] sm:$0xf]  ;;  %v1459_v48 = vld [vmem:[#allocation8 + $0xac] sm:$0xf0]  ;;  %v1734_v52 = vor.u32 %v1462_v42, %v1393_v44 }
  0x1b   :  { %529 = vmatpush.bf16.msrb.mxu1 %v1713_v30  ;;  %1277 = vmatmul.msk.bf16.vlgmr.msra.gmra.mxu2 %vm155_vm0, %v1425_v23  ;;  %v1730_v49 = vor.u32 %v1464_v46, %v1391_v45  ;;  %v1457_v50 = vld [vmem:[#allocation8 + $0xa4] sm:$0xf]  ;;  %v1369_v51 = vld [vmem:[#allocation8 + $0xb0] sm:$0xf0]  ;;  %v1736_v53 = vor.u32 %v1459_v48, %v1367_v47  ;;  %v1458_v54 = vld [vmem:[#allocation8 + $0xac] sm:$0xf] }
  0x1c   :  { %1281 = vmatmul.msk.bf16.vlgmr.msra.gmra.mxu3 %vm155_vm0, %v1425_v23  ;;  %542 = vmatpush.bf16.msrb.mxu2 %v1718_v38  ;;  %v1375_v55 = vld [vmem:[#allocation8 + $0xa8] sm:$0xf]  ;;  %v1460_v56 = vld [vmem:[#allocation8 + $0xb4] sm:$0xf0]  ;;  %v1739_v57 = vor.u32 %v1457_v50, %v1369_v51  ;;  %v1377_v58 = vld [vmem:[#allocation8 + $0xb8] sm:$0xf0] }
  0x1d   :  { %555 = vmatpush.bf16.msrb.mxu3 %v1716_v37  ;;  %v1351_v59 = vld [vmem:[#allocation8 + $0x80] sm:$0xf]  ;;  %v1455_v60 = vld [vmem:[#allocation8 + $0x8c] sm:$0xf0]  ;;  %v1453_v61 = vld [vmem:[#allocation8 + $0x84] sm:$0xf]  ;;  %v1742_v63 = vor.u32 %v1460_v56, %v1375_v55  ;;  %v1746_v0 = vor.u32 %v1458_v54, %v1377_v58 }
  0x1e   :  { %517 = vmatpush.bf16.msrb.mxu0 %v1720_v39  ;;  %v1353_v62 = vld [vmem:[#allocation8 + $0x90] sm:$0xf0]  ;;  %v1748_v1 = vor.u32 %v1455_v60, %v1351_v59  ;;  %v1454_v2 = vld [vmem:[#allocation8 + $0x8c] sm:$0xf]  ;;  %v1359_v3 = vld [vmem:[#allocation8 + $0x88] sm:$0xf] }
  0x1f   :  { %530 = vmatpush.bf16.msrb.mxu1 %v1724_v43  ;;  %v1456_v4 = vld [vmem:[#allocation8 + $0x94] sm:$0xf0]  ;;  %v1751_v5 = vor.u32 %v1453_v61, %v1353_v62  ;;  %v1361_v6 = vld [vmem:[#allocation8 + $0x98] sm:$0xf0]  ;;  %v1335_v7 = vld [vmem:[#allocation8 + $0x60] sm:$0xf] }
  0x20   :  { %543 = vmatpush.bf16.msrb.mxu2 %v1730_v49  ;;  %v1451_v8 = vld [vmem:[#allocation8 + $0x6c] sm:$0xf0]  ;;  %v1449_v9 = vld [vmem:[#allocation8 + $0x64] sm:$0xf]  ;;  %v1337_v10 = vld [vmem:[#allocation8 + $0x70] sm:$0xf0]  ;;  %v1754_v12 = vor.u32 %v1456_v4, %v1359_v3  ;;  %v1758_v13 = vor.u32 %v1454_v2, %v1361_v6 }
  0x21   :  { %556 = vmatpush.bf16.msrb.mxu3 %v1734_v52  ;;  %v1426_v11 = vld [vmem:[#allocation3 + $0x8] sm:$0xff]  ;;  %v1760_v14 = vor.u32 %v1451_v8, %v1335_v7  ;;  %v1452_v17 = vld [vmem:[#allocation8 + $0x74] sm:$0xf0]  ;;  %v1763_v18 = vor.u32 %v1449_v9, %v1337_v10  ;;  %v1345_v19 = vld [vmem:[#allocation8 + $0x78] sm:$0xf0]  ;;  %v2240_v6 = vmov 0  }
  0x22   :  { %518 = vmatpush.bf16.msrb.mxu0 %v1736_v53  ;;  %v1450_v15 = vld [vmem:[#allocation8 + $0x6c] sm:$0xf]  ;;  %v1343_v16 = vld [vmem:[#allocation8 + $0x68] sm:$0xf]  ;;  %v1319_v20 = vld [vmem:[#allocation8 + $0x40] sm:$0xf]  ;;  %1478 = vset.pattern.permute.xlu0 %v2240_v6 }
  0x23   :  { %531 = vmatpush.bf16.msrb.mxu1 %v1739_v57  ;;  %v1447_v21 = vld [vmem:[#allocation8 + $0x4c] sm:$0xf0]  ;;  %v1445_v22 = vld [vmem:[#allocation8 + $0x44] sm:$0xf]  ;;  %v1321_v23 = vld [vmem:[#allocation8 + $0x50] sm:$0xf0]  ;;  %v1766_v24 = vor.u32 %v1452_v17, %v1343_v16  ;;  %v1770_v25 = vor.u32 %v1450_v15, %v1345_v19  ;;  %1479 = vset.pattern.permute.xlu1 %v2240_v6 }
  0x24   :  { %544 = vmatpush.bf16.msrb.mxu2 %v1742_v63  ;;  %v1772_v26 = vor.u32 %v1447_v21, %v1319_v20  ;;  %v1327_v27 = vld [vmem:[#allocation8 + $0x48] sm:$0xf]  ;;  %v1448_v28 = vld [vmem:[#allocation8 + $0x54] sm:$0xf0]  ;;  %v1776_v31 = vor.u32 %v1445_v22, %v1321_v23  ;;  %v1446_v32 = vld [vmem:[#allocation8 + $0x4c] sm:$0xf]  ;;  %1480 = vset.pattern.permute.xlu2 %v2240_v6 }
  0x25   :  { %557 = vmatpush.bf16.msrb.mxu3 %v1746_v0  ;;  %v1329_v33 = vld [vmem:[#allocation8 + $0x58] sm:$0xf0]  ;;  %v1782_v34 = vor.u32 %v1448_v28, %v1327_v27  ;;  %v1303_v35 = vld [vmem:[#allocation8 + $0x20] sm:$0xf]  ;;  %v1443_v36 = vld [vmem:[#allocation8 + $0x2c] sm:$0xf0] }
  0x26   :  { %519 = vmatpush.bf16.msrb.mxu0 %v1748_v1  ;;  %v1441_v40 = vld [vmem:[#allocation8 + $0x24] sm:$0xf]  ;;  %v1786_v41 = vor.u32 %v1446_v32, %v1329_v33  ;;  %v1788_v42 = vor.u32 %v1443_v36, %v1303_v35  ;;  %v1305_v44 = vld [vmem:[#allocation8 + $0x30] sm:$0xf0]  ;;  %v1442_v45 = vld [vmem:[#allocation8 + $0x2c] sm:$0xf] }
  0x27   :  { %532 = vmatpush.bf16.msrb.mxu1 %v1751_v5  ;;  %v1313_v46 = vld [vmem:[#allocation8 + $0x38] sm:$0xf0]  ;;  %v1791_v47 = vor.u32 %v1441_v40, %v1305_v44  ;;  %v1311_v48 = vld [vmem:[#allocation8 + $0x28] sm:$0xf]  ;;  %v1444_v50 = vld [vmem:[#allocation8 + $0x34] sm:$0xf0] }
  0x28   :  { %545 = vmatpush.bf16.msrb.mxu2 %v1754_v12  ;;  %v1287_v51 = vld [vmem:[#allocation8] sm:$0xf]  ;;  %v1439_v54 = vld [vmem:[#allocation8 + $0xc] sm:$0xf0]  ;;  %v1437_v55 = vld [vmem:[#allocation8 + $0x4] sm:$0xf]  ;;  %v1794_v58 = vor.u32 %v1444_v50, %v1311_v48  ;;  %v1798_v59 = vor.u32 %v1442_v45, %v1313_v46 }
  0x29   :  { %558 = vmatpush.bf16.msrb.mxu3 %v1758_v13  ;;  %1270 = vmatmul.msk.bf16.gmra.mxu0 %vm155_vm0, %v1426_v11  ;;  %v1289_v56 = vld [vmem:[#allocation8 + $0x10] sm:$0xf0]  ;;  %v1800_v60 = vor.u32 %v1439_v54, %v1287_v51  ;;  %v1295_v61 = vld [vmem:[#allocation8 + $0x8] sm:$0xf]  ;;  %v1440_v62 = vld [vmem:[#allocation8 + $0x14] sm:$0xf0] }
  0x2a   :  { %520 = vmatpush.bf16.msrb.mxu0 %v1760_v14  ;;  %1274 = vmatmul.msk.bf16.gmra.mxu1 %vm155_vm0, %v1426_v11  ;;  %v1803_v2 = vor.u32 %v1437_v55, %v1289_v56  ;;  %v1438_v3 = vld [vmem:[#allocation8 + $0xc] sm:$0xf]  ;;  %v1297_v4 = vld [vmem:[#allocation8 + $0x18] sm:$0xf0]  ;;  %v1809_v7 = vor.u32 %v1440_v62, %v1295_v61  ;;  %v1427_v9 = vld [vmem:[#allocation3 + $0x10] sm:$0xff]  ;;  %s1203_s15 = sshll.u32 %s2239_s5, 4  ;;  %s1204_s15 = int_to_ptr.hbm [resolvable:$true] %s1203_s15 }
  0x2b   :  { %533 = vmatpush.bf16.msrb.mxu1 %v1763_v18  ;;  %1278 = vmatmul.msk.bf16.gmra.mxu2 %vm155_vm0, %v1426_v11  ;;  %v1813_v8 = vor.u32 %v1438_v3, %v1297_v4  ;;  %v1829_v10 = vld [vmem:[%s2235_s1] sm:$0xff]  ;;  %v1428_v16 = vld [vmem:[#allocation3 + $0x18] sm:$0xff] }
  0x2c   :  { %1282 = vmatmul.msk.bf16.gmra.mxu3 %vm155_vm0, %v1426_v11  ;;  %546 = vmatpush.bf16.msrb.mxu2 %v1766_v24  ;;  %vm586_vm1 = vcmp.gt.s32.totalorder %v1829_v10, 0  ;;  %vm672_vm2 = vcmp.gt.s32.totalorder %v1829_v10, 1  ;;  %vm1102_vm3 = vcmp.gt.s32.totalorder %v1829_v10, 6  ;;  %v85_v21 = vld [vmem:[%s2237_s3] sm:$0xf]  ;;  %vm758_vm6 = vcmp.gt.s32.totalorder %v1829_v10, 2 }
  0x2d   :  { %559 = vmatpush.bf16.msrb.mxu3 %v1770_v25  ;;  %v587_v11 = vsel %vm586_vm1, 1, %v2240_v6  ;;  %v673_v15 = vsel %vm672_vm2, 1, %v2240_v6  ;;  %v1103_v17 = vsel %vm1102_vm3, 1, %v2240_v6  ;;  %v87_v22 = vperm.slane %v85_v21, 0  ;;  %s1671_s3 = smov [#allocation9]  }
  0x2e   :  { %521 = vmatpush.bf16.msrb.mxu0 %v1772_v26  ;;  %589 = vperm.xlu0 %1478, %v587_v11   ;;  %v88_v27 = vperm.slane %v85_v21, 1  ;;  %v1916_v40 = vperm.slane %v85_v21, 2  ;;  %v1918_v44 = vperm.slane %v85_v21, 3  ;;  %vm844_vm7 = vcmp.gt.s32.totalorder %v1829_v10, 3  ;;  %s1201_s12 = sshll.u32 %s1671_s3, 4  ;;  %s1202_s12 = int_to_ptr.vmem [resolvable:$true] %s1201_s12 }
  0x2f   :  { %534 = vmatpush.bf16.msrb.mxu1 %v1776_v31  ;;  %vm1188_vm8 = vcmp.gt.s32.totalorder %v1829_v10, 7  ;;  %vm930_vm11 = vcmp.gt.s32.totalorder %v1829_v10, 4  ;;  %vm1016_vm12 = vcmp.gt.s32.totalorder %v1829_v10, 5 }
  0x30   :  { %547 = vmatpush.bf16.msrb.mxu2 %v1782_v34 }
  0x31   :  { %560 = vmatpush.bf16.msrb.mxu3 %v1786_v41 }
  0x32   :  { %522 = vmatpush.bf16.msrb.mxu0 %v1788_v42 }
  0x33   :  { %535 = vmatpush.bf16.msrb.mxu1 %v1791_v47 }
  0x34   :  { %548 = vmatpush.bf16.msrb.mxu2 %v1794_v58 }
  0x35   :  { %561 = vmatpush.bf16.msrb.mxu3 %v1798_v59 }
  0x36   :  { %523 = vmatpush.bf16.msrb.mxu0 %v1800_v60  ;;  %675 = vperm.xlu0 %1478, %v673_v15  }
  0x37   :  { %536 = vmatpush.bf16.msrb.mxu1 %v1803_v2 }
  0x38   :  { %549 = vmatpush.bf16.msrb.mxu2 %v1809_v7 }
  0x39   :  { %562 = vmatpush.bf16.msrb.mxu3 %v1813_v8  ;;  %1271 = vmatmul.msk.bf16.gmra.mxu0 %vm155_vm0, %v1427_v9 }
  0x3a   :  { %602 = vmatpush.bf16.msra.mxu0 %v1711_v29  ;;  %1275 = vmatmul.msk.bf16.gmra.mxu1 %vm155_vm0, %v1427_v9 }
  0x3b   :  { %615 = vmatpush.bf16.msra.mxu1 %v1713_v30  ;;  %1279 = vmatmul.msk.bf16.gmra.mxu2 %vm155_vm0, %v1427_v9 }
  0x3c   :  { %628 = vmatpush.bf16.msra.mxu2 %v1718_v38  ;;  %1283 = vmatmul.msk.bf16.gmra.mxu3 %vm155_vm0, %v1427_v9 }
  0x3d   :  { %641 = vmatpush.bf16.msra.mxu3 %v1716_v37 }
  0x3e   :  { %603 = vmatpush.bf16.msra.mxu0 %v1720_v39  ;;  %1105 = vperm.xlu0 %1478, %v1103_v17  }
  0x3f   :  { %616 = vmatpush.bf16.msra.mxu1 %v1724_v43 }
  0x40   :  { %629 = vmatpush.bf16.msra.mxu2 %v1730_v49 }
  0x41   :  { %642 = vmatpush.bf16.msra.mxu3 %v1734_v52 }
  0x42   :  { %604 = vmatpush.bf16.msra.mxu0 %v1736_v53 }
  0x43   :  { %617 = vmatpush.bf16.msra.mxu1 %v1739_v57 }
  0x44   :  { %630 = vmatpush.bf16.msra.mxu2 %v1742_v63 }
  0x45   :  { %643 = vmatpush.bf16.msra.mxu3 %v1746_v0 }
  0x46   :  { %605 = vmatpush.bf16.msra.mxu0 %v1748_v1 }
  0x47   :  { %618 = vmatpush.bf16.msra.mxu1 %v1751_v5 }
  0x48   :  { %631 = vmatpush.bf16.msra.mxu2 %v1754_v12 }
  0x49   :  { %644 = vmatpush.bf16.msra.mxu3 %v1758_v13  ;;  %1272 = vmatmul.msk.bf16.gmra.mxu0 %vm155_vm0, %v1428_v16 }
  0x4a   :  { %606 = vmatpush.bf16.msra.mxu0 %v1760_v14  ;;  %1276 = vmatmul.msk.bf16.gmra.mxu1 %vm155_vm0, %v1428_v16 }
  0x4b   :  { %619 = vmatpush.bf16.msra.mxu1 %v1763_v18  ;;  %1280 = vmatmul.msk.bf16.gmra.mxu2 %vm155_vm0, %v1428_v16 }
  0x4c   :  { %632 = vmatpush.bf16.msra.mxu2 %v1766_v24  ;;  %1284 = vmatmul.msk.bf16.gmra.mxu3 %vm155_vm0, %v1428_v16 }
  0x4d   :  { %645 = vmatpush.bf16.msra.mxu3 %v1770_v25 }
  0x4e   :  { %607 = vmatpush.bf16.msra.mxu0 %v1772_v26 }
  0x4f   :  { %620 = vmatpush.bf16.msra.mxu1 %v1776_v31 }
  0x50   :  { %633 = vmatpush.bf16.msra.mxu2 %v1782_v34 }
  0x51   :  { %646 = vmatpush.bf16.msra.mxu3 %v1786_v41 }
  0x52   :  { %608 = vmatpush.bf16.msra.mxu0 %v1788_v42 }
  0x53   :  { %621 = vmatpush.bf16.msra.mxu1 %v1791_v47 }
  0x54   :  { %634 = vmatpush.bf16.msra.mxu2 %v1794_v58 }
  0x55   :  { %647 = vmatpush.bf16.msra.mxu3 %v1798_v59 }
  0x56   :  { %609 = vmatpush.bf16.msra.mxu0 %v1800_v60 }
  0x57   :  { %622 = vmatpush.bf16.msra.mxu1 %v1803_v2 }
  0x58   :  { %635 = vmatpush.bf16.msra.mxu2 %v1809_v7 }
  0x59   :  { %648 = vmatpush.bf16.msra.mxu3 %v1813_v8  ;;  %524 = vmatmul.bf16.vlgmr.msrb.gmra.mxu0 %v2240_v6 }
  0x5a   :  { %537 = vmatmul.bf16.vlgmr.msrb.gmra.mxu1 %v2240_v6  ;;  %688 = vmatpush.bf16.msrb.mxu0 %v1711_v29 }
  0x5b   :  { %550 = vmatmul.bf16.vlgmr.msrb.gmra.mxu2 %v2240_v6  ;;  %701 = vmatpush.bf16.msrb.mxu1 %v1713_v30 }
  0x5c   :  { %563 = vmatmul.bf16.vlgmr.msrb.gmra.mxu3 %v2240_v6  ;;  %714 = vmatpush.bf16.msrb.mxu2 %v1718_v38 }
  0x5d   :  { %727 = vmatpush.bf16.msrb.mxu3 %v1716_v37 }
  0x5e   :  { %689 = vmatpush.bf16.msrb.mxu0 %v1720_v39 }
  0x5f   :  { %702 = vmatpush.bf16.msrb.mxu1 %v1724_v43 }
  0x60   :  { %715 = vmatpush.bf16.msrb.mxu2 %v1730_v49 }
  0x61   :  { %728 = vmatpush.bf16.msrb.mxu3 %v1734_v52 }
  0x62   :  { %690 = vmatpush.bf16.msrb.mxu0 %v1736_v53 }
  0x63   :  { %703 = vmatpush.bf16.msrb.mxu1 %v1739_v57 }
  0x64   :  { %716 = vmatpush.bf16.msrb.mxu2 %v1742_v63 }
  0x65   :  { %729 = vmatpush.bf16.msrb.mxu3 %v1746_v0 }
  0x66   :  { %691 = vmatpush.bf16.msrb.mxu0 %v1748_v1 }
  0x67   :  { %704 = vmatpush.bf16.msrb.mxu1 %v1751_v5 }
  0x68   :  { %717 = vmatpush.bf16.msrb.mxu2 %v1754_v12 }
  0x69   :  { %730 = vmatpush.bf16.msrb.mxu3 %v1758_v13 }
  0x6a   :  { %692 = vmatpush.bf16.msrb.mxu0 %v1760_v14 }
  0x6b   :  { %705 = vmatpush.bf16.msrb.mxu1 %v1763_v18 }
  0x6c   :  { %718 = vmatpush.bf16.msrb.mxu2 %v1766_v24 }
  0x6d   :  { %731 = vmatpush.bf16.msrb.mxu3 %v1770_v25 }
  0x6e   :  { %693 = vmatpush.bf16.msrb.mxu0 %v1772_v26 }
  0x6f   :  { %706 = vmatpush.bf16.msrb.mxu1 %v1776_v31 }
  0x70   :  { %719 = vmatpush.bf16.msrb.mxu2 %v1782_v34 }
  0x71   :  { %732 = vmatpush.bf16.msrb.mxu3 %v1786_v41 }
  0x72   :  { %694 = vmatpush.bf16.msrb.mxu0 %v1788_v42 }
  0x73   :  { %707 = vmatpush.bf16.msrb.mxu1 %v1791_v47 }
  0x74   :  { %720 = vmatpush.bf16.msrb.mxu2 %v1794_v58 }
  0x75   :  { %733 = vmatpush.bf16.msrb.mxu3 %v1798_v59 }
  0x76   :  { %695 = vmatpush.bf16.msrb.mxu0 %v1800_v60 }
  0x77   :  { %708 = vmatpush.bf16.msrb.mxu1 %v1803_v2 }
  0x78   :  { %721 = vmatpush.bf16.msrb.mxu2 %v1809_v7 }
  0x79   :  { %734 = vmatpush.bf16.msrb.mxu3 %v1813_v8 }
  0x96   :  { %v177_v19 = vpop.f32.mrf.mxu0 }
  0x97   :  { %v206_v20 = vpop.f32.mrf.mxu1 }
  0x9e   :  { %v1908_v23 = vpop.f32.mrf.mxu2  ;;  %v179_v32 = vpop.f32.mrf.mxu0 }
  0x9f   :  { %v1910_v28 = vpop.f32.mrf.mxu3  ;;  %v1912_v33 = vadd.f32 %v179_v32, %v87_v22  ;;  %v208_v35 = vpop.f32.mrf.mxu1 }
  0xa0   :  { %v1914_v36 = vadd.f32 %v208_v35, %v88_v27 }
  0xa6   :  { %v237_v45 = vpop.f32.mrf.mxu2  ;;  %v182_v50 = vpop.f32.mrf.mxu0 }
  0xa7   :  { %v1921_v46 = vadd.f32 %v237_v45, %v1916_v40  ;;  %v266_v48 = vpop.f32.mrf.mxu3  ;;  %v1926_v54 = vadd.f32 %v182_v50, %v87_v22  ;;  %v211_v55 = vpop.f32.mrf.mxu1 }
  0xa8   :  { %v1924_v51 = vadd.f32 %v266_v48, %v1918_v44  ;;  %v1928_v56 = vadd.f32 %v211_v55, %v88_v27 }
  0xae   :  { %v240_v61 = vpop.f32.mrf.mxu2  ;;  %v184_v4 = vpop.f32.mrf.mxu0 }
  0xaf   :  { %v1931_v62 = vadd.f32 %v240_v61, %v1916_v40  ;;  %v269_v3 = vpop.f32.mrf.mxu3  ;;  %v1936_v11 = vadd.f32 %v184_v4, %v87_v22  ;;  %v213_v15 = vpop.f32.mrf.mxu1 }
  0xb0   :  { %v1934_v9 = vadd.f32 %v269_v3, %v1918_v44  ;;  %v1938_v16 = vadd.f32 %v213_v15, %v88_v27 }
  0xb1   :  { %2242 = vst [vmem:[#allocation13_spill] sm:$0xff] %v1936_v11 }
  0xb2   :  { %2243 = vst [vmem:[#allocation14_spill] sm:$0xff] %v1938_v16 }
  0xb6   :  { %v242_v17 = vpop.f32.mrf.mxu2  ;;  %v187_v35 = vpop.f32.mrf.mxu0 }
  0xb7   :  { %v1941_v21 = vadd.f32 %v242_v17, %v1916_v40  ;;  %v271_v32 = vpop.f32.mrf.mxu3  ;;  %v1946_v48 = vadd.f32 %v187_v35, %v87_v22  ;;  %v216_v50 = vpop.f32.mrf.mxu1 }
  0xb8   :  { %v1944_v45 = vadd.f32 %v271_v32, %v1918_v44  ;;  %v1948_v55 = vadd.f32 %v216_v50, %v88_v27 }
  0xb9   :  { %2244 = vst [vmem:[#allocation15_spill] sm:$0xff] %v1941_v21 }
  0xba   :  { %2245 = vst [vmem:[#allocation16_spill] sm:$0xff] %v1944_v45 }
  0xbb   :  { %2246 = vst [vmem:[#allocation17_spill] sm:$0xff] %v1946_v48 }
  0xbc   :  { %2247 = vst [vmem:[#allocation18_spill] sm:$0xff] %v1948_v55 }
  0xbe   :  { %v245_v61 = vpop.f32.mrf.mxu2  ;;  %v189_v15 = vpop.f32.mrf.mxu0 }
  0xbf   :  { %v1951_v3 = vadd.f32 %v245_v61, %v1916_v40  ;;  %v274_v4 = vpop.f32.mrf.mxu3  ;;  %v1956_v17 = vadd.f32 %v189_v15, %v87_v22  ;;  %v218_v21 = vpop.f32.mrf.mxu1 }
  0xc0   :  { %v1954_v6 = vadd.f32 %v274_v4, %v1918_v44  ;;  %v1958_v16 = vadd.f32 %v218_v21, %v88_v27 }
  0xc1   :  { %2248 = vst [vmem:[#allocation19_spill] sm:$0xff] %v1951_v3 }
  0xc2   :  { %2249 = vst [vmem:[#allocation20_spill] sm:$0xff] %v1954_v6 }
  0xc3   :  { %2250 = vst [vmem:[#allocation21_spill] sm:$0xff] %v1956_v17 }
  0xc4   :  { %2251 = vst [vmem:[#allocation22_spill] sm:$0xff] %v1958_v16 }
  0xc6   :  { %v247_v32 = vpop.f32.mrf.mxu2  ;;  %v192_v55 = vpop.f32.mrf.mxu0 }
  0xc7   :  { %v1961_v35 = vadd.f32 %v247_v32, %v1916_v40  ;;  %v276_v50 = vpop.f32.mrf.mxu3  ;;  %v1966_v61 = vadd.f32 %v192_v55, %v87_v22  ;;  %v221_v3 = vpop.f32.mrf.mxu1 }
  0xc8   :  { %v1964_v48 = vadd.f32 %v276_v50, %v1918_v44  ;;  %v1968_v45 = vadd.f32 %v221_v3, %v88_v27  ;;  %v178_v50 = vadd.f32 %v177_v19, %v87_v22  ;;  %v265_v19 = vadd.f32 %v1910_v28, %v1918_v44  ;;  %v590_v28 = vpop.permute.xlu0 %589 }
  0xc9   :  { %2252 = vst [vmem:[#allocation23_spill] sm:$0xff] %v1961_v35  ;;  %vm591_vm4 = vcmp.eq.s32.totalorder %v590_v28, 1 }
  0xca   :  { %2253 = vst [vmem:[#allocation24_spill] sm:$0xff] %v1964_v48  ;;  %vm1413_vm5 = vmpackc.low %vm591_vm4, %vm591_vm4 }
  0xcb   :  { %2254 = vst [vmem:[#allocation25_spill] sm:$0xff] %v1966_v61  ;;  %v207_v61 = vadd.f32 %v206_v20, %v88_v27 }
  0xcc   :  { %2255 = vst [vmem:[#allocation26_spill] sm:$0xff] %v1968_v45 }
  0xce   :  { %v250_v4 = vpop.f32.mrf.mxu2  ;;  %v194_v16 = vpop.f32.mrf.mxu0 }
  0xcf   :  { %v1971_v15 = vadd.f32 %v250_v4, %v1916_v40  ;;  %v279_v21 = vpop.f32.mrf.mxu3  ;;  %v1976_v32 = vadd.f32 %v194_v16, %v87_v22  ;;  %v223_v35 = vpop.f32.mrf.mxu1 }
  0xd0   :  { %v1974_v17 = vadd.f32 %v279_v21, %v1918_v44  ;;  %v1978_v6 = vadd.f32 %v223_v35, %v88_v27  ;;  %v236_v35 = vadd.f32 %v1908_v23, %v1916_v40 }
  0xd1   :  { %2256 = vst [vmem:[#allocation27_spill] sm:$0xff] %v1971_v15 }
  0xd2   :  { %2257 = vst [vmem:[#allocation28_spill] sm:$0xff] %v1974_v17 }
  0xd6   :  { %v252_v55 = vpop.f32.mrf.mxu2  ;;  %v525_v48 = vpop.f32.mrf.mxu0 }
  0xd7   :  { %v1981_v3 = vadd.f32 %v252_v55, %v1916_v40  ;;  %v281_v45 = vpop.f32.mrf.mxu3  ;;  %v526_v15 = vadd.f32 %v525_v48, %v178_v50  ;;  %v538_v11 = vpop.f32.mrf.mxu1 }
  0xd8   :  { %v1984_v4 = vadd.f32 %v281_v45, %v1918_v44  ;;  %v539_v21 = vadd.f32 %v538_v11, %v207_v61 }
  0xd9   :  { %2258 = vst [vmem:[#allocation29_spill] sm:$0xff] %v1981_v3  ;;  %v568_v17 = vmul.f32 0.5, %v526_v15 }
  0xda   :  { %2259 = vst [vmem:[#allocation30_spill] sm:$0xff] %v1984_v4  ;;  %v569_v16 = vmul.f32 0.5, %v539_v21 }
  0xdb   :  { %1481 = vtanh.f32 %v568_v17 }
  0xdc   :  { %1483 = vtanh.f32 %v569_v16 }
  0xde   :  { %v551_v20 = vpop.f32.mrf.mxu2  ;;  %v527_v55 = vpop.f32.mrf.mxu0 }
  0xdf   :  { %v552_v22 = vadd.f32 %v551_v20, %v236_v35  ;;  %v564_v27 = vpop.f32.mrf.mxu3  ;;  %v540_v45 = vpop.f32.mrf.mxu1 }
  0xe0   :  { %v565_v3 = vadd.f32 %v564_v27, %v265_v19 }
  0xe1   :  { %v570_v4 = vmul.f32 0.5, %v552_v22  ;;  %v1482_v48 = vpop.eup %1481 }
  0xe2   :  { %1485 = vtanh.f32 %v565_v3  ;;  %v1484_v11 = vpop.eup %1483  ;;  %v574_v61 = vmul.f32 0.5, %v1482_v48 }
  0xe3   :  { %v575_v15 = vmul.f32 0.5, %v1484_v11  ;;  %1487 = vtanh.f32 %v570_v4 }
  0xe4   :  { %v577_v17 = vadd.f32 0.5, %v574_v61 }
  0xe5   :  { %v578_v50 = vadd.f32 0.5, %v575_v15 }
  0xe6   :  { %v553_v23 = vpop.f32.mrf.mxu2 }
  0xe7   :  { %v566_v40 = vpop.f32.mrf.mxu3  ;;  %v581_v16 = vmul.f32 0.0, %v578_v50  ;;  %v2260_v23 = vmov 0  }
  0xe8   :  { %v1486_v21 = vpop.eup %1485  ;;  %v759_v40 = vsel %vm758_vm6, 1, %v2260_v23 }
  0xe9   :  { %v582_v44 = vmul.f32 %v1486_v21, %v577_v17  ;;  %v1488_v35 = vpop.eup %1487  ;;  %761 = vperm.xlu1 %1479, %v759_v40   ;;  %v676_v40 = vpop.permute.xlu0 %675 }
  0xea   :  { %v576_v22 = vmul.f32 0.5, %v1488_v35  ;;  %vm677_vm9 = vcmp.eq.s32.totalorder %v676_v40, 1 }
  0xeb   :  { %v583_v20 = vadd.f32 %v582_v44, %v581_v16 }
  0xec   :  { %v579_v3 = vadd.f32 0.5, %v576_v22 }
  0xed   :  { %1489 = vtanh.f32 %v583_v20  ;;  %v1990_v19 = vsel %vm591_vm4, %v583_v20, 0.0 }
  0xf3   :  { %v1490_v27 = vpop.eup %1489 }
  0xf4   :  { %v585_v55 = vmul.f32 %v1490_v27, %v579_v3 }
  0xf6   :  { %v1992_v45 = vsel %vm591_vm4, %v585_v55, 0.0  ;;  %v1414_v4 = vpack.c.bf16 %v585_v55, %v585_v55 }
  0xf8   :  { %1415 = vmatmul.msk.bf16.vlgmr.msra.gmra.mxu0 %vm1413_vm5, %v1414_v4  ;;  %1418 = vmatmul.msk.bf16.vlgmr.msra.gmra.mxu1 %vm1413_vm5, %v1414_v4 }
  0xf9   :  { %1421 = vmatmul.msk.bf16.vlgmr.msra.gmra.mxu2 %vm1413_vm5, %v1414_v4  ;;  %1424 = vmatmul.msk.bf16.vlgmr.msra.gmra.mxu3 %vm1413_vm5, %v1414_v4 }
  0xfa   :  { %774 = vmatpush.bf16.msra.mxu0 %v1711_v29  ;;  %787 = vmatpush.bf16.msra.mxu1 %v1713_v30 }
  0xfb   :  { %800 = vmatpush.bf16.msra.mxu2 %v1718_v38  ;;  %813 = vmatpush.bf16.msra.mxu3 %v1716_v37 }
  0xfe   :  { %775 = vmatpush.bf16.msra.mxu0 %v1720_v39  ;;  %788 = vmatpush.bf16.msra.mxu1 %v1724_v43 }
  0xff   :  { %801 = vmatpush.bf16.msra.mxu2 %v1730_v49  ;;  %814 = vmatpush.bf16.msra.mxu3 %v1734_v52 }
 0x102   :  { %776 = vmatpush.bf16.msra.mxu0 %v1736_v53  ;;  %789 = vmatpush.bf16.msra.mxu1 %v1739_v57 }
 0x103   :  { %802 = vmatpush.bf16.msra.mxu2 %v1742_v63  ;;  %815 = vmatpush.bf16.msra.mxu3 %v1746_v0 }
 0x106   :  { %777 = vmatpush.bf16.msra.mxu0 %v1748_v1  ;;  %790 = vmatpush.bf16.msra.mxu1 %v1751_v5 }
 0x107   :  { %803 = vmatpush.bf16.msra.mxu2 %v1754_v12  ;;  %816 = vmatpush.bf16.msra.mxu3 %v1758_v13 }
 0x10a   :  { %778 = vmatpush.bf16.msra.mxu0 %v1760_v14  ;;  %791 = vmatpush.bf16.msra.mxu1 %v1763_v18 }
 0x10b   :  { %804 = vmatpush.bf16.msra.mxu2 %v1766_v24  ;;  %817 = vmatpush.bf16.msra.mxu3 %v1770_v25 }
 0x10e   :  { %779 = vmatpush.bf16.msra.mxu0 %v1772_v26  ;;  %792 = vmatpush.bf16.msra.mxu1 %v1776_v31 }
 0x10f   :  { %805 = vmatpush.bf16.msra.mxu2 %v1782_v34  ;;  %818 = vmatpush.bf16.msra.mxu3 %v1786_v41 }
 0x112   :  { %780 = vmatpush.bf16.msra.mxu0 %v1788_v42  ;;  %793 = vmatpush.bf16.msra.mxu1 %v1791_v47 }
 0x113   :  { %806 = vmatpush.bf16.msra.mxu2 %v1794_v58  ;;  %819 = vmatpush.bf16.msra.mxu3 %v1798_v59 }
 0x116   :  { %781 = vmatpush.bf16.msra.mxu0 %v1800_v60  ;;  %794 = vmatpush.bf16.msra.mxu1 %v1803_v2 }
 0x117   :  { %807 = vmatpush.bf16.msra.mxu2 %v1809_v7  ;;  %820 = vmatpush.bf16.msra.mxu3 %v1813_v8 }
 0x175   :  { %v611_v48 = vpop.f32.mrf.mxu0  ;;  %v624_v11 = vpop.f32.mrf.mxu1 }
 0x176   :  { %v612_v61 = vadd.f32 %v611_v48, %v1912_v33  ;;  %v625_v15 = vadd.f32 %v624_v11, %v1914_v36  ;;  %v845_v36 = vsel %vm844_vm7, 1, %v2260_v23 }
 0x177   :  { %847 = vperm.xlu1 %1479, %v845_v36  }
 0x178   :  { %v654_v17 = vmul.f32 0.5, %v612_v61  ;;  %v655_v50 = vmul.f32 0.5, %v625_v15 }
 0x17a   :  { %1491 = vtanh.f32 %v654_v17  ;;  %v1189_v17 = vsel %vm1188_vm8, 1, %v2260_v23 }
 0x17b   :  { %1493 = vtanh.f32 %v655_v50 }
 0x17c   :  { %v637_v21 = vpop.f32.mrf.mxu2  ;;  %v650_v16 = vpop.f32.mrf.mxu3 }
 0x17d   :  { %v638_v28 = vadd.f32 %v637_v21, %v1921_v46  ;;  %v651_v44 = vadd.f32 %v650_v16, %v1924_v51  ;;  %v613_v33 = vpop.f32.mrf.mxu0  ;;  %v626_v35 = vpop.f32.mrf.mxu1 }
 0x17f   :  { %v656_v20 = vmul.f32 0.5, %v638_v28  ;;  %1495 = vtanh.f32 %v651_v44  ;;  %1191 = vperm.xlu1 %1479, %v1189_v17  }
 0x180   :  { %v1492_v22 = vpop.eup %1491 }
 0x181   :  { %v1494_v3 = vpop.eup %1493  ;;  %v660_v27 = vmul.f32 0.5, %v1492_v22  ;;  %1497 = vtanh.f32 %v656_v20 }
 0x182   :  { %v661_v55 = vmul.f32 0.5, %v1494_v3 }
 0x183   :  { %v663_v4 = vadd.f32 0.5, %v660_v27 }
 0x184   :  { %v664_v48 = vadd.f32 0.5, %v661_v55  ;;  %v639_v11 = vpop.f32.mrf.mxu2  ;;  %v652_v46 = vpop.f32.mrf.mxu3 }
 0x185   :  { %v1496_v61 = vpop.eup %1495 }
 0x186   :  { %v667_v51 = vmul.f32 %v664_v48, %v1990_v19  ;;  %v668_v15 = vmul.f32 %v1496_v61, %v663_v4 }
 0x187   :  { %v1498_v50 = vpop.eup %1497 }
 0x188   :  { %v669_v21 = vadd.f32 %v668_v15, %v667_v51  ;;  %v662_v28 = vmul.f32 0.5, %v1498_v50 }
 0x18a   :  { %1499 = vtanh.f32 %v669_v21  ;;  %v2038_v16 = vsel %vm677_vm9, %v669_v21, %v1990_v19  ;;  %v665_v44 = vadd.f32 0.5, %v662_v28 }
 0x190   :  { %v1500_v33 = vpop.eup %1499 }
 0x191   :  { %v671_v35 = vmul.f32 %v1500_v33, %v665_v44 }
 0x193   :  { %v2041_v36 = vsel %vm677_vm9, %v671_v35, %v1992_v45 }
 0x194   :  { %v680_v20 = vpack.c.bf16 %v2041_v36, %v2041_v36 }
 0x196   :  { %696 = vmatmul.bf16.vlgmr.msrb.gmra.mxu0 %v680_v20  ;;  %709 = vmatmul.bf16.vlgmr.msrb.gmra.mxu1 %v680_v20 }
 0x197   :  { %722 = vmatmul.bf16.vlgmr.msrb.gmra.mxu2 %v680_v20  ;;  %735 = vmatmul.bf16.vlgmr.msrb.gmra.mxu3 %v680_v20  ;;  %v762_v20 = vpop.permute.xlu1 %761 }
 0x198   :  { %860 = vmatpush.bf16.msrb.mxu0 %v1711_v29  ;;  %873 = vmatpush.bf16.msrb.mxu1 %v1713_v30  ;;  %vm763_vm10 = vcmp.eq.s32.totalorder %v762_v20, 1  ;;  %v1017_v20 = vsel %vm1016_vm12, 1, %v2260_v23 }
 0x199   :  { %886 = vmatpush.bf16.msrb.mxu2 %v1718_v38  ;;  %899 = vmatpush.bf16.msrb.mxu3 %v1716_v37 }
 0x19c   :  { %861 = vmatpush.bf16.msrb.mxu0 %v1720_v39  ;;  %874 = vmatpush.bf16.msrb.mxu1 %v1724_v43 }
 0x19d   :  { %887 = vmatpush.bf16.msrb.mxu2 %v1730_v49  ;;  %900 = vmatpush.bf16.msrb.mxu3 %v1734_v52 }
 0x1a0   :  { %862 = vmatpush.bf16.msrb.mxu0 %v1736_v53  ;;  %875 = vmatpush.bf16.msrb.mxu1 %v1739_v57 }
 0x1a1   :  { %888 = vmatpush.bf16.msrb.mxu2 %v1742_v63  ;;  %901 = vmatpush.bf16.msrb.mxu3 %v1746_v0 }
 0x1a4   :  { %863 = vmatpush.bf16.msrb.mxu0 %v1748_v1  ;;  %876 = vmatpush.bf16.msrb.mxu1 %v1751_v5 }
 0x1a5   :  { %889 = vmatpush.bf16.msrb.mxu2 %v1754_v12  ;;  %902 = vmatpush.bf16.msrb.mxu3 %v1758_v13 }
 0x1a8   :  { %864 = vmatpush.bf16.msrb.mxu0 %v1760_v14  ;;  %877 = vmatpush.bf16.msrb.mxu1 %v1763_v18 }
 0x1a9   :  { %890 = vmatpush.bf16.msrb.mxu2 %v1766_v24  ;;  %903 = vmatpush.bf16.msrb.mxu3 %v1770_v25 }
 0x1ac   :  { %865 = vmatpush.bf16.msrb.mxu0 %v1772_v26  ;;  %878 = vmatpush.bf16.msrb.mxu1 %v1776_v31 }
 0x1ad   :  { %891 = vmatpush.bf16.msrb.mxu2 %v1782_v34  ;;  %904 = vmatpush.bf16.msrb.mxu3 %v1786_v41 }
 0x1b0   :  { %866 = vmatpush.bf16.msrb.mxu0 %v1788_v42  ;;  %879 = vmatpush.bf16.msrb.mxu1 %v1791_v47 }
 0x1b1   :  { %892 = vmatpush.bf16.msrb.mxu2 %v1794_v58  ;;  %905 = vmatpush.bf16.msrb.mxu3 %v1798_v59 }
 0x1b4   :  { %867 = vmatpush.bf16.msrb.mxu0 %v1800_v60  ;;  %880 = vmatpush.bf16.msrb.mxu1 %v1803_v2 }
 0x1b5   :  { %893 = vmatpush.bf16.msrb.mxu2 %v1809_v7  ;;  %906 = vmatpush.bf16.msrb.mxu3 %v1813_v8 }
 0x213   :  { %v697_v19 = vpop.f32.mrf.mxu0  ;;  %v710_v45 = vpop.f32.mrf.mxu1 }
 0x214   :  { %v698_v22 = vadd.f32 %v697_v19, %v1926_v54  ;;  %v711_v3 = vadd.f32 %v710_v45, %v1928_v56 }
 0x216   :  { %v740_v27 = vmul.f32 0.5, %v698_v22  ;;  %v741_v55 = vmul.f32 0.5, %v711_v3 }
 0x218   :  { %1501 = vtanh.f32 %v740_v27 }
 0x219   :  { %1503 = vtanh.f32 %v741_v55 }
 0x21a   :  { %v723_v4 = vpop.f32.mrf.mxu2  ;;  %v736_v48 = vpop.f32.mrf.mxu3 }
 0x21b   :  { %v724_v11 = vadd.f32 %v723_v4, %v1931_v62  ;;  %v737_v46 = vadd.f32 %v736_v48, %v1934_v9  ;;  %v699_v61 = vpop.f32.mrf.mxu0  ;;  %v712_v51 = vpop.f32.mrf.mxu1 }
 0x21c   :  { %v2262_v61 = vld [vmem:[#allocation14_spill] sm:$0xff] }
 0x21d   :  { %v742_v15 = vmul.f32 0.5, %v724_v11  ;;  %1505 = vtanh.f32 %v737_v46  ;;  %v2261_v11 = vld [vmem:[#allocation13_spill] sm:$0xff] }
 0x21e   :  { %v1502_v17 = vpop.eup %1501 }
 0x21f   :  { %v1504_v50 = vpop.eup %1503  ;;  %v746_v40 = vmul.f32 0.5, %v1502_v17  ;;  %1507 = vtanh.f32 %v742_v15 }
 0x220   :  { %v747_v54 = vmul.f32 0.5, %v1504_v50  ;;  %v931_v50 = vsel %vm930_vm11, 1, %v2260_v23 }
 0x221   :  { %v749_v56 = vadd.f32 0.5, %v746_v40  ;;  %933 = vperm.xlu2 %1480, %v931_v50  }
 0x222   :  { %v750_v21 = vadd.f32 0.5, %v747_v54  ;;  %v725_v28 = vpop.f32.mrf.mxu2  ;;  %v738_v44 = vpop.f32.mrf.mxu3 }
 0x223   :  { %v1506_v33 = vpop.eup %1505  ;;  %v2264_v28 = vld [vmem:[#allocation16_spill] sm:$0xff] }
 0x224   :  { %v754_v35 = vmul.f32 %v1506_v33, %v749_v56  ;;  %v753_v62 = vmul.f32 %v750_v21, %v2038_v16  ;;  %v2263_v56 = vld [vmem:[#allocation15_spill] sm:$0xff] }
 0x225   :  { %v1508_v9 = vpop.eup %1507 }
 0x226   :  { %v755_v19 = vadd.f32 %v754_v35, %v753_v62  ;;  %v748_v22 = vmul.f32 0.5, %v1508_v9 }
 0x228   :  { %1509 = vtanh.f32 %v755_v19  ;;  %v2083_v45 = vsel %vm763_vm10, %v755_v19, %v2038_v16  ;;  %v751_v3 = vadd.f32 0.5, %v748_v22 }
 0x229   :  { %1019 = vperm.xlu2 %1480, %v1017_v20  }
 0x22e   :  { %v1510_v27 = vpop.eup %1509 }
 0x22f   :  { %v757_v55 = vmul.f32 %v1510_v27, %v751_v3 }
 0x231   :  { %v2086_v4 = vsel %vm763_vm10, %v757_v55, %v2041_v36 }
 0x232   :  { %v766_v48 = vpack.c.bf16 %v2086_v4, %v2086_v4 }
 0x234   :  { %782 = vmatmul.bf16.vlgmr.msra.gmra.mxu0 %v766_v48  ;;  %795 = vmatmul.bf16.vlgmr.msra.gmra.mxu1 %v766_v48 }
 0x235   :  { %808 = vmatmul.bf16.vlgmr.msra.gmra.mxu2 %v766_v48  ;;  %821 = vmatmul.bf16.vlgmr.msra.gmra.mxu3 %v766_v48 }
 0x236   :  { %946 = vmatpush.bf16.msra.mxu0 %v1711_v29  ;;  %959 = vmatpush.bf16.msra.mxu1 %v1713_v30 }
 0x237   :  { %972 = vmatpush.bf16.msra.mxu2 %v1718_v38  ;;  %985 = vmatpush.bf16.msra.mxu3 %v1716_v37 }
 0x23a   :  { %947 = vmatpush.bf16.msra.mxu0 %v1720_v39  ;;  %960 = vmatpush.bf16.msra.mxu1 %v1724_v43 }
 0x23b   :  { %973 = vmatpush.bf16.msra.mxu2 %v1730_v49  ;;  %986 = vmatpush.bf16.msra.mxu3 %v1734_v52 }
 0x23e   :  { %948 = vmatpush.bf16.msra.mxu0 %v1736_v53  ;;  %961 = vmatpush.bf16.msra.mxu1 %v1739_v57 }
 0x23f   :  { %974 = vmatpush.bf16.msra.mxu2 %v1742_v63  ;;  %987 = vmatpush.bf16.msra.mxu3 %v1746_v0 }
 0x242   :  { %949 = vmatpush.bf16.msra.mxu0 %v1748_v1  ;;  %962 = vmatpush.bf16.msra.mxu1 %v1751_v5 }
 0x243   :  { %975 = vmatpush.bf16.msra.mxu2 %v1754_v12  ;;  %988 = vmatpush.bf16.msra.mxu3 %v1758_v13 }
 0x246   :  { %950 = vmatpush.bf16.msra.mxu0 %v1760_v14  ;;  %963 = vmatpush.bf16.msra.mxu1 %v1763_v18 }
 0x247   :  { %976 = vmatpush.bf16.msra.mxu2 %v1766_v24  ;;  %989 = vmatpush.bf16.msra.mxu3 %v1770_v25 }
 0x24a   :  { %951 = vmatpush.bf16.msra.mxu0 %v1772_v26  ;;  %964 = vmatpush.bf16.msra.mxu1 %v1776_v31 }
 0x24b   :  { %977 = vmatpush.bf16.msra.mxu2 %v1782_v34  ;;  %990 = vmatpush.bf16.msra.mxu3 %v1786_v41 }
 0x24e   :  { %952 = vmatpush.bf16.msra.mxu0 %v1788_v42  ;;  %965 = vmatpush.bf16.msra.mxu1 %v1791_v47 }
 0x24f   :  { %978 = vmatpush.bf16.msra.mxu2 %v1794_v58  ;;  %991 = vmatpush.bf16.msra.mxu3 %v1798_v59 }
 0x252   :  { %953 = vmatpush.bf16.msra.mxu0 %v1800_v60  ;;  %966 = vmatpush.bf16.msra.mxu1 %v1803_v2 }
 0x253   :  { %979 = vmatpush.bf16.msra.mxu2 %v1809_v7  ;;  %992 = vmatpush.bf16.msra.mxu3 %v1813_v8 }
 0x2b1   :  { %v783_v16 = vpop.f32.mrf.mxu0  ;;  %v796_v36 = vpop.f32.mrf.mxu1 }
 0x2b2   :  { %v784_v46 = vadd.f32 %v783_v16, %v2261_v11  ;;  %v797_v51 = vadd.f32 %v796_v36, %v2262_v61  ;;  %v848_v61 = vpop.permute.xlu1 %847 }
 0x2b3   :  { %vm849_vm13 = vcmp.eq.s32.totalorder %v848_v61, 1 }
 0x2b4   :  { %v826_v15 = vmul.f32 0.5, %v784_v46  ;;  %v827_v17 = vmul.f32 0.5, %v797_v51 }
 0x2b6   :  { %1511 = vtanh.f32 %v826_v15 }
 0x2b7   :  { %1513 = vtanh.f32 %v827_v17 }
 0x2b8   :  { %v809_v40 = vpop.f32.mrf.mxu2  ;;  %v822_v54 = vpop.f32.mrf.mxu3 }
 0x2b9   :  { %v810_v21 = vadd.f32 %v809_v40, %v2263_v56  ;;  %v823_v44 = vadd.f32 %v822_v54, %v2264_v28  ;;  %v785_v33 = vpop.f32.mrf.mxu0  ;;  %v798_v35 = vpop.f32.mrf.mxu1 }
 0x2bb   :  { %v828_v62 = vmul.f32 0.5, %v810_v21  ;;  %1515 = vtanh.f32 %v823_v44  ;;  %v2265_v21 = vld [vmem:[#allocation17_spill] sm:$0xff]  ;;  %v2266_v44 = vld [vmem:[#allocation18_spill] sm:$0xff] }
 0x2bc   :  { %v1512_v9 = vpop.eup %1511 }
 0x2bd   :  { %v1514_v19 = vpop.eup %1513  ;;  %v832_v22 = vmul.f32 0.5, %v1512_v9  ;;  %1517 = vtanh.f32 %v828_v62 }
 0x2be   :  { %v833_v3 = vmul.f32 0.5, %v1514_v19  ;;  %v2267_v19 = vld [vmem:[#allocation19_spill] sm:$0xff] }
 0x2bf   :  { %v835_v27 = vadd.f32 0.5, %v832_v22 }
 0x2c0   :  { %v836_v10 = vadd.f32 0.5, %v833_v3  ;;  %v811_v55 = vpop.f32.mrf.mxu2  ;;  %v824_v48 = vpop.f32.mrf.mxu3  ;;  %v2268_v3 = vld [vmem:[#allocation20_spill] sm:$0xff] }
 0x2c1   :  { %v1516_v16 = vpop.eup %1515 }
 0x2c2   :  { %v839_v36 = vmul.f32 %v836_v10, %v2083_v45  ;;  %v840_v11 = vmul.f32 %v1516_v16, %v835_v27 }
 0x2c3   :  { %v1518_v46 = vpop.eup %1517 }
 0x2c4   :  { %v841_v51 = vadd.f32 %v840_v11, %v839_v36  ;;  %v834_v15 = vmul.f32 0.5, %v1518_v46 }
 0x2c6   :  { %1519 = vtanh.f32 %v841_v51  ;;  %v2132_v23 = vsel %vm849_vm13, %v841_v51, %v2083_v45  ;;  %v837_v17 = vadd.f32 0.5, %v834_v15  ;;  %v934_v51 = vpop.permute.xlu2 %933 }
 0x2c7   :  { %vm935_vm14 = vcmp.eq.s32.totalorder %v934_v51, 1 }
 0x2cc   :  { %v1520_v50 = vpop.eup %1519 }
 0x2cd   :  { %v843_v40 = vmul.f32 %v1520_v50, %v837_v17 }
 0x2cf   :  { %v2135_v54 = vsel %vm849_vm13, %v843_v40, %v2086_v4 }
 0x2d0   :  { %v852_v56 = vpack.c.bf16 %v2135_v54, %v2135_v54 }
 0x2d2   :  { %868 = vmatmul.bf16.vlgmr.msrb.gmra.mxu0 %v852_v56  ;;  %881 = vmatmul.bf16.vlgmr.msrb.gmra.mxu1 %v852_v56 }
 0x2d3   :  { %894 = vmatmul.bf16.vlgmr.msrb.gmra.mxu2 %v852_v56  ;;  %907 = vmatmul.bf16.vlgmr.msrb.gmra.mxu3 %v852_v56 }
 0x2d4   :  { %1032 = vmatpush.bf16.msrb.mxu0 %v1711_v29  ;;  %1045 = vmatpush.bf16.msrb.mxu1 %v1713_v30 }
 0x2d5   :  { %1058 = vmatpush.bf16.msrb.mxu2 %v1718_v38  ;;  %1071 = vmatpush.bf16.msrb.mxu3 %v1716_v37 }
 0x2d8   :  { %1033 = vmatpush.bf16.msrb.mxu0 %v1720_v39  ;;  %1046 = vmatpush.bf16.msrb.mxu1 %v1724_v43 }
 0x2d9   :  { %1059 = vmatpush.bf16.msrb.mxu2 %v1730_v49  ;;  %1072 = vmatpush.bf16.msrb.mxu3 %v1734_v52 }
 0x2dc   :  { %1034 = vmatpush.bf16.msrb.mxu0 %v1736_v53  ;;  %1047 = vmatpush.bf16.msrb.mxu1 %v1739_v57 }
 0x2dd   :  { %1060 = vmatpush.bf16.msrb.mxu2 %v1742_v63  ;;  %1073 = vmatpush.bf16.msrb.mxu3 %v1746_v0 }
 0x2e0   :  { %1035 = vmatpush.bf16.msrb.mxu0 %v1748_v1  ;;  %1048 = vmatpush.bf16.msrb.mxu1 %v1751_v5 }
 0x2e1   :  { %1061 = vmatpush.bf16.msrb.mxu2 %v1754_v12  ;;  %1074 = vmatpush.bf16.msrb.mxu3 %v1758_v13 }
 0x2e4   :  { %1036 = vmatpush.bf16.msrb.mxu0 %v1760_v14  ;;  %1049 = vmatpush.bf16.msrb.mxu1 %v1763_v18 }
 0x2e5   :  { %1062 = vmatpush.bf16.msrb.mxu2 %v1766_v24  ;;  %1075 = vmatpush.bf16.msrb.mxu3 %v1770_v25 }
 0x2e8   :  { %1037 = vmatpush.bf16.msrb.mxu0 %v1772_v26  ;;  %1050 = vmatpush.bf16.msrb.mxu1 %v1776_v31 }
 0x2e9   :  { %1063 = vmatpush.bf16.msrb.mxu2 %v1782_v34  ;;  %1076 = vmatpush.bf16.msrb.mxu3 %v1786_v41 }
 0x2ec   :  { %1038 = vmatpush.bf16.msrb.mxu0 %v1788_v42  ;;  %1051 = vmatpush.bf16.msrb.mxu1 %v1791_v47 }
 0x2ed   :  { %1064 = vmatpush.bf16.msrb.mxu2 %v1794_v58  ;;  %1077 = vmatpush.bf16.msrb.mxu3 %v1798_v59 }
 0x2f0   :  { %1039 = vmatpush.bf16.msrb.mxu0 %v1800_v60  ;;  %1052 = vmatpush.bf16.msrb.mxu1 %v1803_v2 }
 0x2f1   :  { %1065 = vmatpush.bf16.msrb.mxu2 %v1809_v7  ;;  %1078 = vmatpush.bf16.msrb.mxu3 %v1813_v8 }
 0x34f   :  { %v869_v45 = vpop.f32.mrf.mxu0  ;;  %v882_v4 = vpop.f32.mrf.mxu1 }
 0x350   :  { %v870_v28 = vadd.f32 %v869_v45, %v2265_v21  ;;  %v883_v33 = vadd.f32 %v882_v4, %v2266_v44 }
 0x352   :  { %v912_v35 = vmul.f32 0.5, %v870_v28  ;;  %v913_v20 = vmul.f32 0.5, %v883_v33 }
 0x354   :  { %1521 = vtanh.f32 %v912_v35 }
 0x355   :  { %1523 = vtanh.f32 %v913_v20 }
 0x356   :  { %v895_v62 = vpop.f32.mrf.mxu2  ;;  %v908_v9 = vpop.f32.mrf.mxu3 }
 0x357   :  { %v896_v22 = vadd.f32 %v895_v62, %v2267_v19  ;;  %v909_v27 = vadd.f32 %v908_v9, %v2268_v3  ;;  %v871_v10 = vpop.f32.mrf.mxu0  ;;  %v884_v55 = vpop.f32.mrf.mxu1 }
 0x359   :  { %v914_v48 = vmul.f32 0.5, %v896_v22  ;;  %1525 = vtanh.f32 %v909_v27 }
 0x35a   :  { %v1522_v16 = vpop.eup %1521 }
 0x35b   :  { %v1524_v36 = vpop.eup %1523  ;;  %v918_v11 = vmul.f32 0.5, %v1522_v16  ;;  %1527 = vtanh.f32 %v914_v48  ;;  %v2273_v48 = vld [vmem:[#allocation25_spill] sm:$0xff] }
 0x35c   :  { %v919_v46 = vmul.f32 0.5, %v1524_v36  ;;  %v2274_v36 = vld [vmem:[#allocation26_spill] sm:$0xff] }
 0x35d   :  { %v921_v61 = vadd.f32 0.5, %v918_v11 }
 0x35e   :  { %v922_v15 = vadd.f32 0.5, %v919_v46  ;;  %v897_v17 = vpop.f32.mrf.mxu2  ;;  %v910_v50 = vpop.f32.mrf.mxu3 }
 0x35f   :  { %v1526_v40 = vpop.eup %1525  ;;  %v2275_v17 = vld [vmem:[#allocation27_spill] sm:$0xff] }
 0x360   :  { %v926_v56 = vmul.f32 %v1526_v40, %v921_v61  ;;  %v925_v45 = vmul.f32 %v922_v15, %v2132_v23  ;;  %v2276_v40 = vld [vmem:[#allocation28_spill] sm:$0xff] }
 0x361   :  { %v1528_v4 = vpop.eup %1527 }
 0x362   :  { %v927_v21 = vadd.f32 %v926_v56, %v925_v45  ;;  %v920_v44 = vmul.f32 0.5, %v1528_v4 }
 0x364   :  { %1529 = vtanh.f32 %v927_v21  ;;  %v2177_v28 = vsel %vm935_vm14, %v927_v21, %v2132_v23  ;;  %v923_v33 = vadd.f32 0.5, %v920_v44 }
 0x36a   :  { %v1530_v35 = vpop.eup %1529 }
 0x36b   :  { %v929_v20 = vmul.f32 %v1530_v35, %v923_v33 }
 0x36d   :  { %v2180_v62 = vsel %vm935_vm14, %v929_v20, %v2135_v54 }
 0x36e   :  { %v938_v9 = vpack.c.bf16 %v2180_v62, %v2180_v62 }
 0x370   :  { %954 = vmatmul.bf16.vlgmr.msra.gmra.mxu0 %v938_v9  ;;  %967 = vmatmul.bf16.vlgmr.msra.gmra.mxu1 %v938_v9 }
 0x371   :  { %980 = vmatmul.bf16.vlgmr.msra.gmra.mxu2 %v938_v9  ;;  %993 = vmatmul.bf16.vlgmr.msra.gmra.mxu3 %v938_v9 }
 0x372   :  { %1118 = vmatpush.bf16.msra.mxu0 %v1711_v29  ;;  %1131 = vmatpush.bf16.msra.mxu1 %v1713_v30 }
 0x373   :  { %1144 = vmatpush.bf16.msra.mxu2 %v1718_v38  ;;  %1157 = vmatpush.bf16.msra.mxu3 %v1716_v37  ;;  %v2269_v37 = vld [vmem:[#allocation21_spill] sm:$0xff] }
 0x376   :  { %1119 = vmatpush.bf16.msra.mxu0 %v1720_v39  ;;  %1132 = vmatpush.bf16.msra.mxu1 %v1724_v43  ;;  %v2270_v39 = vld [vmem:[#allocation22_spill] sm:$0xff] }
 0x377   :  { %1145 = vmatpush.bf16.msra.mxu2 %v1730_v49  ;;  %1158 = vmatpush.bf16.msra.mxu3 %v1734_v52 }
 0x37a   :  { %1120 = vmatpush.bf16.msra.mxu0 %v1736_v53  ;;  %1133 = vmatpush.bf16.msra.mxu1 %v1739_v57 }
 0x37b   :  { %1146 = vmatpush.bf16.msra.mxu2 %v1742_v63  ;;  %1159 = vmatpush.bf16.msra.mxu3 %v1746_v0  ;;  %v2271_v63 = vld [vmem:[#allocation23_spill] sm:$0xff] }
 0x37e   :  { %1121 = vmatpush.bf16.msra.mxu0 %v1748_v1  ;;  %1134 = vmatpush.bf16.msra.mxu1 %v1751_v5  ;;  %v2272_v1 = vld [vmem:[#allocation24_spill] sm:$0xff] }
 0x37f   :  { %1147 = vmatpush.bf16.msra.mxu2 %v1754_v12  ;;  %1160 = vmatpush.bf16.msra.mxu3 %v1758_v13 }
 0x382   :  { %1122 = vmatpush.bf16.msra.mxu0 %v1760_v14  ;;  %1135 = vmatpush.bf16.msra.mxu1 %v1763_v18 }
 0x383   :  { %1148 = vmatpush.bf16.msra.mxu2 %v1766_v24  ;;  %1161 = vmatpush.bf16.msra.mxu3 %v1770_v25 }
 0x386   :  { %1123 = vmatpush.bf16.msra.mxu0 %v1772_v26  ;;  %1136 = vmatpush.bf16.msra.mxu1 %v1776_v31 }
 0x387   :  { %1149 = vmatpush.bf16.msra.mxu2 %v1782_v34  ;;  %1162 = vmatpush.bf16.msra.mxu3 %v1786_v41 }
 0x38a   :  { %1124 = vmatpush.bf16.msra.mxu0 %v1788_v42  ;;  %1137 = vmatpush.bf16.msra.mxu1 %v1791_v47 }
 0x38b   :  { %1150 = vmatpush.bf16.msra.mxu2 %v1794_v58  ;;  %1163 = vmatpush.bf16.msra.mxu3 %v1798_v59  ;;  %v1020_v58 = vpop.permute.xlu2 %1019 }
 0x38c   :  { %vm1021_vm15 = vcmp.eq.s32.totalorder %v1020_v58, 1 }
 0x38e   :  { %1125 = vmatpush.bf16.msra.mxu0 %v1800_v60  ;;  %1138 = vmatpush.bf16.msra.mxu1 %v1803_v2 }
 0x38f   :  { %1151 = vmatpush.bf16.msra.mxu2 %v1809_v7  ;;  %1164 = vmatpush.bf16.msra.mxu3 %v1813_v8 }
 0x3ed   :  { %v955_v29 = vpop.f32.mrf.mxu0  ;;  %v968_v30 = vpop.f32.mrf.mxu1 }
 0x3ee   :  { %v956_v38 = vadd.f32 %v955_v29, %v2269_v37  ;;  %v969_v43 = vadd.f32 %v968_v30, %v2270_v39  ;;  %v1106_v37 = vpop.permute.xlu0 %1105 }
 0x3ef   :  { %vm1107_vm0 = vcmp.eq.s32.totalorder %v1106_v37, 1 }
 0x3f0   :  { %v998_v49 = vmul.f32 0.5, %v956_v38  ;;  %v999_v52 = vmul.f32 0.5, %v969_v43 }
 0x3f2   :  { %1531 = vtanh.f32 %v998_v49 }
 0x3f3   :  { %1533 = vtanh.f32 %v999_v52 }
 0x3f4   :  { %v981_v53 = vpop.f32.mrf.mxu2  ;;  %v994_v57 = vpop.f32.mrf.mxu3 }
 0x3f5   :  { %v982_v0 = vadd.f32 %v981_v53, %v2271_v63  ;;  %v995_v5 = vadd.f32 %v994_v57, %v2272_v1  ;;  %v957_v12 = vpop.f32.mrf.mxu0  ;;  %v970_v13 = vpop.f32.mrf.mxu1 }
 0x3f7   :  { %v1000_v14 = vmul.f32 0.5, %v982_v0  ;;  %1535 = vtanh.f32 %v995_v5 }
 0x3f8   :  { %v1532_v18 = vpop.eup %1531 }
 0x3f9   :  { %v1534_v24 = vpop.eup %1533  ;;  %v1004_v25 = vmul.f32 0.5, %v1532_v18  ;;  %1537 = vtanh.f32 %v1000_v14 }
 0x3fa   :  { %v1005_v26 = vmul.f32 0.5, %v1534_v24 }
 0x3fb   :  { %v1007_v31 = vadd.f32 0.5, %v1004_v25 }
 0x3fc   :  { %v1008_v34 = vadd.f32 0.5, %v1005_v26  ;;  %v983_v41 = vpop.f32.mrf.mxu2  ;;  %v996_v42 = vpop.f32.mrf.mxu3 }
 0x3fd   :  { %v1536_v47 = vpop.eup %1535  ;;  %v2278_v42 = vld [vmem:[#allocation30_spill] sm:$0xff] }
 0x3fe   :  { %v1011_v59 = vmul.f32 %v1008_v34, %v2177_v28  ;;  %v1012_v60 = vmul.f32 %v1536_v47, %v1007_v31  ;;  %v2277_v34 = vld [vmem:[#allocation29_spill] sm:$0xff] }
 0x3ff   :  { %v1538_v2 = vpop.eup %1537 }
 0x400   :  { %v1013_v7 = vadd.f32 %v1012_v60, %v1011_v59  ;;  %v1006_v23 = vmul.f32 0.5, %v1538_v2 }
 0x402   :  { %1539 = vtanh.f32 %v1013_v7  ;;  %v1023_v8 = vsel %vm1021_vm15, %v1013_v7, %v2177_v28  ;;  %v1009_v54 = vadd.f32 0.5, %v1006_v23 }
 0x408   :  { %v1540_v19 = vpop.eup %1539 }
 0x409   :  { %v1015_v22 = vmul.f32 %v1540_v19, %v1009_v54 }
 0x40b   :  { %v1022_v3 = vsel %vm1021_vm15, %v1015_v22, %v2180_v62 }
 0x40c   :  { %v1024_v27 = vpack.c.bf16 %v1022_v3, %v1022_v3 }
 0x40e   :  { %1040 = vmatmul.bf16.vlgmr.msrb.gmra.mxu0 %v1024_v27  ;;  %1053 = vmatmul.bf16.vlgmr.msrb.gmra.mxu1 %v1024_v27 }
 0x40f   :  { %1066 = vmatmul.bf16.vlgmr.msrb.gmra.mxu2 %v1024_v27  ;;  %1079 = vmatmul.bf16.vlgmr.msrb.gmra.mxu3 %v1024_v27 }
 0x48b   :  { %v1041_v10 = vpop.f32.mrf.mxu0  ;;  %v1054_v55 = vpop.f32.mrf.mxu1 }
 0x48c   :  { %v1042_v16 = vadd.f32 %v1041_v10, %v2273_v48  ;;  %v1055_v11 = vadd.f32 %v1054_v55, %v2274_v36 }
 0x48e   :  { %v1084_v46 = vmul.f32 0.5, %v1042_v16  ;;  %v1085_v61 = vmul.f32 0.5, %v1055_v11  ;;  %v1192_v16 = vpop.permute.xlu1 %1191 }
 0x48f   :  { %vm1193_vm1 = vcmp.eq.s32.totalorder %v1192_v16, 1 }
 0x490   :  { %1541 = vtanh.f32 %v1084_v46 }
 0x491   :  { %1543 = vtanh.f32 %v1085_v61 }
 0x492   :  { %v1067_v51 = vpop.f32.mrf.mxu2  ;;  %v1080_v15 = vpop.f32.mrf.mxu3 }
 0x493   :  { %v1068_v50 = vadd.f32 %v1067_v51, %v2275_v17  ;;  %v1081_v56 = vadd.f32 %v1080_v15, %v2276_v40  ;;  %v1043_v45 = vpop.f32.mrf.mxu0  ;;  %v1056_v4 = vpop.f32.mrf.mxu1 }
 0x495   :  { %v1086_v21 = vmul.f32 0.5, %v1068_v50  ;;  %1545 = vtanh.f32 %v1081_v56 }
 0x496   :  { %v1542_v28 = vpop.eup %1541 }
 0x497   :  { %v1544_v44 = vpop.eup %1543  ;;  %v1090_v33 = vmul.f32 0.5, %v1542_v28  ;;  %1547 = vtanh.f32 %v1086_v21 }
 0x498   :  { %v1091_v35 = vmul.f32 0.5, %v1544_v44 }
 0x499   :  { %v1093_v20 = vadd.f32 0.5, %v1090_v33 }
 0x49a   :  { %v1094_v62 = vadd.f32 0.5, %v1091_v35  ;;  %v1069_v9 = vpop.f32.mrf.mxu2  ;;  %v1082_v29 = vpop.f32.mrf.mxu3 }
 0x49b   :  { %v1546_v30 = vpop.eup %1545 }
 0x49c   :  { %v1097_v38 = vmul.f32 %v1094_v62, %v1023_v8  ;;  %v1098_v39 = vmul.f32 %v1546_v30, %v1093_v20 }
 0x49d   :  { %v1548_v43 = vpop.eup %1547 }
 0x49e   :  { %v1099_v49 = vadd.f32 %v1098_v39, %v1097_v38  ;;  %v1092_v53 = vmul.f32 0.5, %v1548_v43 }
 0x4a0   :  { %1549 = vtanh.f32 %v1099_v49  ;;  %v1109_v52 = vsel %vm1107_vm0, %v1099_v49, %v1023_v8  ;;  %v1095_v57 = vadd.f32 0.5, %v1092_v53 }
 0x4a6   :  { %v1550_v63 = vpop.eup %1549 }
 0x4a7   :  { %v1101_v0 = vmul.f32 %v1550_v63, %v1095_v57 }
 0x4a9   :  { %v1108_v1 = vsel %vm1107_vm0, %v1101_v0, %v1022_v3 }
 0x4aa   :  { %v1110_v5 = vpack.c.bf16 %v1108_v1, %v1108_v1 }
 0x4ac   :  { %1126 = vmatmul.bf16.vlgmr.msra.gmra.mxu0 %v1110_v5  ;;  %1139 = vmatmul.bf16.vlgmr.msra.gmra.mxu1 %v1110_v5 }
 0x4ad   :  { %1152 = vmatmul.bf16.vlgmr.msra.gmra.mxu2 %v1110_v5  ;;  %1165 = vmatmul.bf16.vlgmr.msra.gmra.mxu3 %v1110_v5 }
 0x529   :  { %v1127_v12 = vpop.f32.mrf.mxu0  ;;  %v1140_v13 = vpop.f32.mrf.mxu1 }
 0x52a   :  { %v1128_v14 = vadd.f32 %v1127_v12, %v1976_v32  ;;  %v1141_v18 = vadd.f32 %v1140_v13, %v1978_v6 }
 0x52c   :  { %v1170_v24 = vmul.f32 0.5, %v1128_v14  ;;  %v1171_v25 = vmul.f32 0.5, %v1141_v18 }
 0x52e   :  { %1551 = vtanh.f32 %v1170_v24 }
 0x52f   :  { %1553 = vtanh.f32 %v1171_v25 }
 0x530   :  { %v1153_v26 = vpop.f32.mrf.mxu2  ;;  %v1166_v31 = vpop.f32.mrf.mxu3 }
 0x531   :  { %v1154_v41 = vadd.f32 %v1153_v26, %v2277_v34  ;;  %v1167_v47 = vadd.f32 %v1166_v31, %v2278_v42  ;;  %v1129_v58 = vpop.f32.mrf.mxu0  ;;  %v1142_v59 = vpop.f32.mrf.mxu1 }
 0x533   :  { %v1172_v60 = vmul.f32 0.5, %v1154_v41  ;;  %1555 = vtanh.f32 %v1167_v47 }
 0x534   :  { %v1552_v2 = vpop.eup %1551 }
 0x535   :  { %v1554_v7 = vpop.eup %1553  ;;  %v1176_v8 = vmul.f32 0.5, %v1552_v2  ;;  %1557 = vtanh.f32 %v1172_v60 }
 0x536   :  { %v1177_v32 = vmul.f32 0.5, %v1554_v7 }
 0x537   :  { %v1179_v6 = vadd.f32 0.5, %v1176_v8 }
 0x538   :  { %v1180_v23 = vadd.f32 0.5, %v1177_v32  ;;  %v1155_v54 = vpop.f32.mrf.mxu2  ;;  %v1168_v19 = vpop.f32.mrf.mxu3 }
 0x539   :  { %v1556_v22 = vpop.eup %1555 }
 0x53a   :  { %v1183_v3 = vmul.f32 %v1180_v23, %v1109_v52  ;;  %v1184_v27 = vmul.f32 %v1556_v22, %v1179_v6 }
 0x53b   :  { %v1558_v10 = vpop.eup %1557 }
 0x53c   :  { %v1185_v55 = vadd.f32 %v1184_v27, %v1183_v3  ;;  %v1178_v48 = vmul.f32 0.5, %v1558_v10 }
 0x53e   :  { %1559 = vtanh.f32 %v1185_v55  ;;  %v1181_v36 = vadd.f32 0.5, %v1178_v48 }
 0x544   :  { %v1560_v11 = vpop.eup %1559 }
 0x545   :  { %v1187_v46 = vmul.f32 %v1560_v11, %v1181_v36 }
 0x547   :  { %v1194_v61 = vsel %vm1193_vm1, %v1187_v46, %v1108_v1 }
 0x548   :  { %1195 = vst [vmem:[#allocation9] sm:$0xff] %v1194_v61 }
 0x549   :  { %1206 = dma.vmem_to_hbm [thread:$0]  %s1202_s12, 128, %s1204_s15, [#allocation5]  }
 0x54a   :  { %1661 = dma.done.wait [#allocation5], 128  }
 0x54b   :  { %1662 = vsyncadd [#allocation5], 4294967168 }
 0x54c   :  { %1211 = vsyncpa [#allocation4], 1 }
 0x54d   :  { %1212 = vsyncpa [#allocation7], 1 }
 0x54e   :  { %1213 = vsyncpa [#allocation5], 1 }

</bundles_post_ra>
